<compile_context>
chip_gen: v6e
topology: v6e:2x2x1
jax: 0.10.0
libtpu: 0.0.40
codegen_flags: <defaults>
</compile_context>

<pallas_src>
import functools

import jax
import jax.numpy as jnp
from jax.experimental import pallas as pl
from jax.experimental.pallas import tpu as pltpu

IN_DIM = 28 * 28        # 784
IN_PAD = 896            # 7 * 128, lane-aligned K for fc1
HID = 512
NUM_CLASSES = 10
OUT_PAD = 128           # lane-dense logits; slice to 10 afterwards


def _round_up(n, m):
    return (n + m - 1) // m * m


def mlp_kernel(x_ref, w1_ref, b1_ref, w2_ref, b2_ref, w3_ref, b3_ref, out_ref):
    # fc1 + relu  (bf16 matmul, f32 accumulate / elementwise)
    x = x_ref[...]
    h1 = jnp.dot(x, w1_ref[...], preferred_element_type=jnp.float32) + b1_ref[...]
    h1 = jnp.maximum(h1, 0.0).astype(jnp.bfloat16)
    # fc2 + relu
    h2 = jnp.dot(h1, w2_ref[...], preferred_element_type=jnp.float32) + b2_ref[...]
    h2 = jnp.maximum(h2, 0.0).astype(jnp.bfloat16)
    # fc3 (padded to 128 lanes; padded columns carry -1e30 f32 bias -> softmax 0)
    logits = jnp.dot(h2, w3_ref[...], preferred_element_type=jnp.float32) + b3_ref[...]
    # softmax over class axis (dim=1)
    m = jnp.max(logits, axis=-1, keepdims=True)
    e = jnp.exp(logits - m)
    denom = jnp.sum(e, axis=-1, keepdims=True)
    out_ref[...] = e * pl.reciprocal(denom, approx=True)


@functools.partial(jax.jit, static_argnames=("tm",))
def mlp_forward(x, params, *, tm=256):
    """x: (B, 784) float32 -> (B, 10) softmax probabilities."""
    w1, b1, w2, b2, w3, b3 = params  # already padded / bf16 (see init_params)
    B = x.shape[0]

    # Pick a batch tile (multiple of 8) and pad the batch to a whole number of tiles.
    tm_eff = min(tm, _round_up(B, 8))
    b_pad = _round_up(B, tm_eff)
    if b_pad != B:
        x = jnp.pad(x, ((0, b_pad - B), (0, 0)))
    # Zero-pad features 784 -> 896 and feed the MXU in bf16.
    x_p = jnp.pad(x, ((0, 0), (0, IN_PAD - IN_DIM))).astype(jnp.bfloat16)

    grid = (b_pad // tm_eff,)
    const = lambda i: (0, 0)  # weights/biases resident across grid steps

    flops = 2 * b_pad * (IN_PAD * HID + HID * HID + HID * OUT_PAD)
    bytes_accessed = (
        x_p.size * 2                                   # bf16 activations in
        + (w1.size + w2.size + w3.size) * 2            # bf16 weights
        + (b1.size + b2.size + b3.size) * 4            # f32 biases
        + b_pad * OUT_PAD * 4                          # f32 probabilities out
    )
    transcendentals = b_pad * (OUT_PAD + 1)            # exp + reciprocal

    out = pl.pallas_call(
        mlp_kernel,
        out_shape=jax.ShapeDtypeStruct((b_pad, OUT_PAD), jnp.float32),
        grid=grid,
        in_specs=[
            pl.BlockSpec((tm_eff, IN_PAD), lambda i: (i, 0)),
            pl.BlockSpec((IN_PAD, HID), const),
            pl.BlockSpec((1, HID), const),
            pl.BlockSpec((HID, HID), const),
            pl.BlockSpec((1, HID), const),
            pl.BlockSpec((HID, OUT_PAD), const),
            pl.BlockSpec((1, OUT_PAD), const),
        ],
        out_specs=pl.BlockSpec((tm_eff, OUT_PAD), lambda i: (i, 0)),
        compiler_params=pltpu.CompilerParams(
            dimension_semantics=("parallel",),
        ),
        cost_estimate=pl.CostEstimate(
            flops=flops,
            transcendentals=transcendentals,
            bytes_accessed=bytes_accessed,
        ),
    )(x_p, w1, b1, w2, b2, w3, b3)
    return out[:B, :NUM_CLASSES]


def init_params(key):
    """Deterministic PyTorch-style Linear init: U(-1/sqrt(fan_in), 1/sqrt(fan_in)).
    Weights are stored pre-transposed (in, out), pre-padded, and cast to bf16 once."""
    ks = jax.random.split(key, 6)

    def linear(kw, kb, fan_in, fan_out):
        bound = 1.0 / jnp.sqrt(jnp.float32(fan_in))
        w = jax.random.uniform(kw, (fan_in, fan_out), jnp.float32, -bound, bound)
        b = jax.random.uniform(kb, (fan_out,), jnp.float32, -bound, bound)
        return w, b

    w1, b1 = linear(ks[0], ks[1], IN_DIM, HID)
    w2, b2 = linear(ks[2], ks[3], HID, HID)
    w3, b3 = linear(ks[4], ks[5], HID, NUM_CLASSES)

    # fc1: zero-pad K 784 -> 896, cast to bf16 (padded x columns are zero too).
    w1_p = jnp.zeros((IN_PAD, HID), jnp.float32).at[:IN_DIM, :].set(w1).astype(jnp.bfloat16)
    b1_p = b1.reshape(1, HID)                                    # f32
    w2_p = w2.astype(jnp.bfloat16)
    b2_p = b2.reshape(1, HID)                                    # f32
    # fc3: pad to 128 output lanes once; bias stays f32 so -1e30 is exact/safe.
    w3_p = jnp.zeros((HID, OUT_PAD), jnp.float32).at[:, :NUM_CLASSES].set(w3).astype(jnp.bfloat16)
    b3_p = jnp.full((1, OUT_PAD), -1e30, jnp.float32).at[:, :NUM_CLASSES].set(b3)

    return (w1_p, b1_p, w2_p, b2_p, w3_p, b3_p)


def mlp_reference(x, params):
    """Same math in plain JAX (bf16 matmuls, f32 accumulate) for a sanity check."""
    w1, b1, w2, b2, w3, b3 = params
    x_p = jnp.pad(x, ((0, 0), (0, IN_PAD - IN_DIM))).astype(jnp.bfloat16)
    h1 = jnp.dot(x_p, w1, preferred_element_type=jnp.float32) + b1
    h1 = jnp.maximum(h1, 0.0).astype(jnp.bfloat16)
    h2 = jnp.dot(h1, w2, preferred_element_type=jnp.float32) + b2
    h2 = jnp.maximum(h2, 0.0).astype(jnp.bfloat16)
    logits = jnp.dot(h2, w3, preferred_element_type=jnp.float32) + b3
    probs = jax.nn.softmax(logits, axis=-1)
    return probs[:, :NUM_CLASSES]


if __name__ == "__main__":
    key = jax.random.PRNGKey(0)
    k_x, k_p = jax.random.split(key)

    B = 8
    # mimic flattened MNIST-like input scaled to [0, 1)
    x = jax.random.uniform(k_x, (B, IN_DIM), jnp.float32, 0.0, 1.0)
    params = init_params(k_p)

    probs = mlp_forward(x, params)
    probs = jax.block_until_ready(probs)

    # sanity: shape, softmax rows sum to ~1, matches plain-JAX reference
    assert probs.shape == (B, NUM_CLASSES)
    row_sums = jnp.sum(probs, axis=-1)
    assert bool(jnp.all(jnp.abs(row_sums - 1.0) < 1e-2))
    ref = mlp_reference(x, params)
    assert bool(jnp.max(jnp.abs(probs - ref)) < 1e-2)

    print("KERNEL_OK")
</pallas_src>

<mosaic_0001>
module attributes {stable_mosaic.version = 11 : i64} {
  func.func @mlp_kernel(%arg0: i32, %arg1: memref<8x896xbf16, #tpu.memory_space<vmem>>, %arg2: memref<896x512xbf16, #tpu.memory_space<vmem>>, %arg3: memref<1x512xf32, #tpu.memory_space<vmem>>, %arg4: memref<512x512xbf16, #tpu.memory_space<vmem>>, %arg5: memref<1x512xf32, #tpu.memory_space<vmem>>, %arg6: memref<512x128xbf16, #tpu.memory_space<vmem>>, %arg7: memref<1x128xf32, #tpu.memory_space<vmem>>, %arg8: memref<8x128xf32, #tpu.memory_space<vmem>>) attributes {dimension_semantics = [#tpu.dimension_semantics<parallel>], iteration_bounds = array<i64: 1>, scalar_prefetch = 0 : i64, scratch_operands = 0 : i64, tpu.core_type = #tpu.core_type<tc>, window_params = [{transform_indices = @transform_0, window_bounds = array<i64: 8, 896>}, {pipeline_mode = #tpu.pipeline_mode<synchronous>, transform_indices = @transform_1, window_bounds = array<i64: 896, 512>}, {pipeline_mode = #tpu.pipeline_mode<synchronous>, transform_indices = @transform_2, window_bounds = array<i64: 1, 512>}, {pipeline_mode = #tpu.pipeline_mode<synchronous>, transform_indices = @transform_3, window_bounds = array<i64: 512, 512>}, {pipeline_mode = #tpu.pipeline_mode<synchronous>, transform_indices = @transform_4, window_bounds = array<i64: 1, 512>}, {pipeline_mode = #tpu.pipeline_mode<synchronous>, transform_indices = @transform_5, window_bounds = array<i64: 512, 128>}, {pipeline_mode = #tpu.pipeline_mode<synchronous>, transform_indices = @transform_6, window_bounds = array<i64: 1, 128>}, {transform_indices = @transform_7, window_bounds = array<i64: 8, 128>}]} {
    %c0 = arith.constant 0 : index
    %c0_0 = arith.constant 0 : index
    %0 = vector.load %arg1[%c0, %c0_0] : memref<8x896xbf16, #tpu.memory_space<vmem>>, vector<8x896xbf16>
    %c0_1 = arith.constant 0 : index
    %c0_2 = arith.constant 0 : index
    %1 = vector.load %arg2[%c0_1, %c0_2] : memref<896x512xbf16, #tpu.memory_space<vmem>>, vector<896x512xbf16>
    %cst = arith.constant dense<0.000000e+00> : vector<8x512xf32>
    %2 = tpu.matmul %0, %1, %cst {dimension_numbers = #tpu.dot_dimension_numbers<[1], [0], [0], [1], [0, 0, 1, 1], [], []>} : vector<8x896xbf16>, vector<896x512xbf16>, vector<8x512xf32> -> vector<8x512xf32>
    %c0_3 = arith.constant 0 : index
    %c0_4 = arith.constant 0 : index
    %3 = vector.load %arg3[%c0_3, %c0_4] : memref<1x512xf32, #tpu.memory_space<vmem>>, vector<1x512xf32>
    %4 = vector.broadcast %3 : vector<1x512xf32> to vector<8x512xf32>
    %5 = arith.addf %2, %4 : vector<8x512xf32>
    %cst_5 = arith.constant 0.000000e+00 : f32
    %6 = vector.broadcast %cst_5 : f32 to vector<8x512xf32>
    %7 = arith.maximumf %5, %6 : vector<8x512xf32>
    %8 = arith.truncf %7 : vector<8x512xf32> to vector<8x512xbf16>
    %c0_6 = arith.constant 0 : index
    %c0_7 = arith.constant 0 : index
    %9 = vector.load %arg4[%c0_6, %c0_7] : memref<512x512xbf16, #tpu.memory_space<vmem>>, vector<512x512xbf16>
    %cst_8 = arith.constant dense<0.000000e+00> : vector<8x512xf32>
    %10 = tpu.matmul %8, %9, %cst_8 {dimension_numbers = #tpu.dot_dimension_numbers<[1], [0], [0], [1], [0, 0, 1, 1], [], []>} : vector<8x512xbf16>, vector<512x512xbf16>, vector<8x512xf32> -> vector<8x512xf32>
    %c0_9 = arith.constant 0 : index
    %c0_10 = arith.constant 0 : index
    %11 = vector.load %arg5[%c0_9, %c0_10] : memref<1x512xf32, #tpu.memory_space<vmem>>, vector<1x512xf32>
    %12 = vector.broadcast %11 : vector<1x512xf32> to vector<8x512xf32>
    %13 = arith.addf %10, %12 : vector<8x512xf32>
    %cst_11 = arith.constant 0.000000e+00 : f32
    %14 = vector.broadcast %cst_11 : f32 to vector<8x512xf32>
    %15 = arith.maximumf %13, %14 : vector<8x512xf32>
    %16 = arith.truncf %15 : vector<8x512xf32> to vector<8x512xbf16>
    %c0_12 = arith.constant 0 : index
    %c0_13 = arith.constant 0 : index
    %17 = vector.load %arg6[%c0_12, %c0_13] : memref<512x128xbf16, #tpu.memory_space<vmem>>, vector<512x128xbf16>
    %cst_14 = arith.constant dense<0.000000e+00> : vector<8x128xf32>
    %18 = tpu.matmul %16, %17, %cst_14 {dimension_numbers = #tpu.dot_dimension_numbers<[1], [0], [0], [1], [0, 0, 1, 1], [], []>} : vector<8x512xbf16>, vector<512x128xbf16>, vector<8x128xf32> -> vector<8x128xf32>
    %c0_15 = arith.constant 0 : index
    %c0_16 = arith.constant 0 : index
    %19 = vector.load %arg7[%c0_15, %c0_16] : memref<1x128xf32, #tpu.memory_space<vmem>>, vector<1x128xf32>
    %20 = vector.broadcast %19 : vector<1x128xf32> to vector<8x128xf32>
    %21 = arith.addf %18, %20 : vector<8x128xf32>
    %cst_17 = arith.constant dense<0xFF800000> : vector<8xf32>
    %22 = vector.multi_reduction <maximumf>, %21, %cst_17 [1] : vector<8x128xf32> to vector<8xf32>
    %23 = vector.shape_cast %22 : vector<8xf32> to vector<8x1xf32>
    %24 = vector.broadcast %23 : vector<8x1xf32> to vector<8x128xf32>
    %25 = arith.subf %21, %24 : vector<8x128xf32>
    %26 = math.exp %25 : vector<8x128xf32>
    %cst_18 = arith.constant dense<0.000000e+00> : vector<8xf32>
    %27 = vector.multi_reduction <add>, %26, %cst_18 [1] : vector<8x128xf32> to vector<8xf32>
    %28 = vector.shape_cast %27 : vector<8xf32> to vector<8x1xf32>
    %29 = tpu.reciprocal %28 {approx = true} : vector<8x1xf32> -> vector<8x1xf32>
    %30 = vector.broadcast %29 : vector<8x1xf32> to vector<8x128xf32>
    %31 = arith.mulf %26, %30 : vector<8x128xf32>
    %c0_19 = arith.constant 0 : index
    %c0_20 = arith.constant 0 : index
    %32 = vector.load %arg8[%c0_19, %c0_20] : memref<8x128xf32, #tpu.memory_space<vmem>>, vector<8x128xf32>
    tpu.vector_store %arg8[%c0_19, %c0_20], %31 {strides = array<i32>} : memref<8x128xf32, #tpu.memory_space<vmem>>, vector<8x128xf32>,
    return
  }
  func.func @transform_0(%arg0: i32) -> (i32, i32) {
    %c0_i32 = arith.constant 0 : i32
    %c0_i32_0 = arith.constant 0 : i32
    return %arg0, %c0_i32 : i32, i32
  }
  func.func @transform_1(%arg0: i32) -> (i32, i32) {
    %c0_i32 = arith.constant 0 : i32
    %c0_i32_0 = arith.constant 0 : i32
    %c0_i32_1 = arith.constant 0 : i32
    return %c0_i32, %c0_i32_0 : i32, i32
  }
  func.func @transform_2(%arg0: i32) -> (i32, i32) {
    %c0_i32 = arith.constant 0 : i32
    %c0_i32_0 = arith.constant 0 : i32
    %c0_i32_1 = arith.constant 0 : i32
    return %c0_i32, %c0_i32_0 : i32, i32
  }
  func.func @transform_3(%arg0: i32) -> (i32, i32) {
    %c0_i32 = arith.constant 0 : i32
    %c0_i32_0 = arith.constant 0 : i32
    %c0_i32_1 = arith.constant 0 : i32
    return %c0_i32, %c0_i32_0 : i32, i32
  }
  func.func @transform_4(%arg0: i32) -> (i32, i32) {
    %c0_i32 = arith.constant 0 : i32
    %c0_i32_0 = arith.constant 0 : i32
    %c0_i32_1 = arith.constant 0 : i32
    return %c0_i32, %c0_i32_0 : i32, i32
  }
  func.func @transform_5(%arg0: i32) -> (i32, i32) {
    %c0_i32 = arith.constant 0 : i32
    %c0_i32_0 = arith.constant 0 : i32
    %c0_i32_1 = arith.constant 0 : i32
    return %c0_i32, %c0_i32_0 : i32, i32
  }
  func.func @transform_6(%arg0: i32) -> (i32, i32) {
    %c0_i32 = arith.constant 0 : i32
    %c0_i32_0 = arith.constant 0 : i32
    %c0_i32_1 = arith.constant 0 : i32
    return %c0_i32, %c0_i32_0 : i32, i32
  }
  func.func @transform_7(%arg0: i32) -> (i32, i32) {
    %c0_i32 = arith.constant 0 : i32
    %c0_i32_0 = arith.constant 0 : i32
    return %arg0, %c0_i32 : i32, i32
  }
}

</mosaic_0001>

<bundles_post_ra>
// kernel: mlp_forward.1
= control target key start
LH: loop header
LB: loop body
LE: loop exit
PB: predicated region body
PF: predicated region fallthrough
CT: control target
= control target key end

     0   :  { %12 = vsyncpa [#allocation3], 0  ;;  %s4399_s0 = inlined_call_operand.vmem [shape: bf16[8,896], index: 0, kind: input, shape index: {}]   ;;  %s4400_s1 = inlined_call_operand.hbm [shape: bf16[896,512], index: 1, kind: input, shape index: {}]   ;;  %s4401_s2 = inlined_call_operand.vmem [shape: f32[1,512], index: 2, kind: input, shape index: {}]   ;;  %s4402_s3 = inlined_call_operand.hbm [shape: bf16[512,512], index: 3, kind: input, shape index: {}]   ;;  %s4403_s4 = inlined_call_operand.vmem [shape: f32[1,512], index: 4, kind: input, shape index: {}]   ;;  %s4404_s5 = inlined_call_operand.hbm [shape: bf16[512,128], index: 5, kind: input, shape index: {}]   ;;  %s4405_s6 = inlined_call_operand.vmem [shape: f32[1,128], index: 6, kind: input, shape index: {}]   ;;  %s4406_s7 = inlined_call_operand.hbm [shape: f32[8,128], index: 7, kind: output, shape index: {}]  }
   0x1   :  { %13 = vsyncpa [#allocation6], 0 }
   0x2   :  { %14 = vsyncpa [#allocation4], 0  ;;  %s4234_s24 = smov [#allocation5]   ;;  %s4235_s26 = smov [#allocation2]  }
   0x3   :  { %s36_s25 = sshll.u32 %s4234_s24, 4  ;;  %s22_s27 = sshll.u32 %s4235_s26, 4  ;;  %s37_s25 = int_to_ptr.vmem [resolvable:$true] %s36_s25  ;;  %s23_s27 = int_to_ptr.vmem [resolvable:$true] %s22_s27 }
   0x4   :  { %s4156_s28 = scalar_lea.vmem %s37_s25, 16384  ;;  %p4161_p1 = scmp.lt.s32.totalorder %s37_s25, %s37_s25 }
   0x5   :  { %p4157_p0 = scmp.ne.s32.totalorder %s37_s25, %s4156_s28  ;;  %p4162_p2 = scmp.lt.s32.totalorder %s4156_s28, %s4156_s28 }
   0x7   :  { %p4163_p3 = por %p4162_p2, %p4161_p1 }
   0x9   :  { %p4164_p4 = pnand %p4163_p3, %p4157_p0 }
   0xb   :  { %4167 = shalt.err (!%p4164_p4)
}
   0xc   :  { %s4236_s29 = smov 256   ;;  %s4237_s30 = smov 16  }
   0xd   :  { %42 = dma.hbm_to_vmem [thread:$0]  %s4402_s3, 16384, %s37_s25, [#allocation6], %s4236_s29, %s4236_s29, %s4237_s30  }
   0xe   :  { %s4176_s10 = scalar_lea.vmem %s23_s27, 28672  ;;  %p4181_p6 = scmp.lt.s32.totalorder %s23_s27, %s23_s27 }
   0xf   :  { %p4177_p5 = scmp.ne.s32.totalorder %s23_s27, %s4176_s10  ;;  %p4182_p7 = scmp.lt.s32.totalorder %s4176_s10, %s4176_s10 }
  0x11   :  { %p4183_p8 = por %p4182_p7, %p4181_p6 }
  0x13   :  { %p4184_p9 = pnand %p4183_p8, %p4177_p5 }
  0x15   :  { %4187 = shalt.err (!%p4184_p9)
}
  0x16   :  { %28 = dma.hbm_to_vmem [thread:$0]  %s4400_s1, 28672, %s23_s27, [#allocation3], %s4236_s29, %s4236_s29, %s4237_s30  }
  0x17   :  { %s4238_s13 = smov [#allocation7]  }
  0x18   :  { %s50_s14 = sshll.u32 %s4238_s13, 4  ;;  %s51_s14 = int_to_ptr.vmem [resolvable:$true] %s50_s14 }
  0x19   :  { %s4196_s15 = scalar_lea.vmem %s51_s14, 4096  ;;  %p4201_p11 = scmp.lt.s32.totalorder %s51_s14, %s51_s14 }
  0x1a   :  { %p4197_p10 = scmp.ne.s32.totalorder %s51_s14, %s4196_s15  ;;  %p4202_p12 = scmp.lt.s32.totalorder %s4196_s15, %s4196_s15 }
  0x1c   :  { %p4203_p13 = por %p4202_p12, %p4201_p11 }
  0x1e   :  { %p4204_p0 = pnand %p4203_p13, %p4197_p10 }
  0x20   :  { %4207 = shalt.err (!%p4204_p0)
}
  0x21   :  { %s4239_s3 = smov 64   ;;  %s4240_s16 = smov 4  }
  0x22   :  { %56 = dma.hbm_to_vmem [thread:$0]  %s4404_s5, 4096, %s51_s14, [#allocation6], %s4239_s3, %s4239_s3, %s4240_s16  }
  0x23   :  { %4228 = dma.done.wait [#allocation3], 28672  }
  0x24   :  { %4229 = vsyncadd [#allocation3], 4294938624 }
  0x25   :  { %4230 = dma.done.wait [#allocation6], 20480  }
  0x26   :  { %4231 = vsyncadd [#allocation6], 4294946816  ;;  %v3576_v0 = vld [vmem:[#allocation2 + $0xe4] ss:$16 sps:$4 sm:$0xff]   ;;  %v3580_v2 = vld [vmem:[#allocation2 + $0xe0] ss:$16 sps:$4 sm:$0xff]  }
  0x27   :  { %v3578_v1 = vld [vmem:[#allocation2 + $0x2e4] ss:$16 sps:$4 sm:$0xff]   ;;  %1464 = vmatprep.subr.bf16.mxu0 %v3576_v0  ;;  %v3581_v3 = vld [vmem:[#allocation2 + $0x2e0] ss:$16 sps:$4 sm:$0xff]   ;;  %v70_v48 = vld [vmem:[%s4399_s0 + $0x8] sm:$0xff]  ;;  %s4242_s30 = smov [#allocation8]  }
  0x28   :  { %1505 = vmatprep.subr.bf16.mxu1 %v3578_v1  ;;  %v3582_v4 = vld [vmem:[#allocation2 + $0xc4] ss:$16 sps:$4 sm:$0xff]   ;;  %1465 = vmatpush1.bf16.msra.mxu0 %v3580_v2  ;;  %v3586_v6 = vld [vmem:[#allocation2 + $0xc0] ss:$16 sps:$4 sm:$0xff]   ;;  %v4300_v51 = vcombine.high %v70_v48, %v70_v48  ;;  %s3121_s8 = sshll.u32 %s4242_s30, 4  ;;  %s3122_s8 = int_to_ptr.vmem [resolvable:$true] %s3121_s8 }
  0x29   :  { %1506 = vmatpush1.bf16.msra.mxu1 %v3581_v3  ;;  %v3584_v5 = vld [vmem:[#allocation2 + $0x2c4] ss:$16 sps:$4 sm:$0xff]   ;;  %1466 = vmatprep.subr.bf16.mxu0 %v3582_v4  ;;  %v3587_v7 = vld [vmem:[#allocation2 + $0x2c0] ss:$16 sps:$4 sm:$0xff]   ;;  %p4213_p2 = scmp.lt.s32.totalorder %s3122_s8, %s3122_s8 }
  0x2a   :  { %1507 = vmatprep.subr.bf16.mxu1 %v3584_v5  ;;  %v3588_v8 = vld [vmem:[#allocation2 + $0xa4] ss:$16 sps:$4 sm:$0xff]   ;;  %v3592_v10 = vld [vmem:[#allocation2 + $0xa0] ss:$16 sps:$4 sm:$0xff]   ;;  %1537 = vmatprep.mubr.bf16.mxu1 %v4300_v51 }
  0x2b   :  { %v3590_v9 = vld [vmem:[#allocation2 + $0x2a4] ss:$16 sps:$4 sm:$0xff]   ;;  %v3593_v11 = vld [vmem:[#allocation2 + $0x2a0] ss:$16 sps:$4 sm:$0xff]  }
  0x2c   :  { %1467 = vmatpush1.bf16.msra.mxu0 %v3586_v6  ;;  %v3594_v12 = vld [vmem:[#allocation2 + $0x84] ss:$16 sps:$4 sm:$0xff]   ;;  %v3598_v14 = vld [vmem:[#allocation2 + $0x80] ss:$16 sps:$4 sm:$0xff]  }
  0x2d   :  { %1508 = vmatpush1.bf16.msra.mxu1 %v3587_v7  ;;  %1468 = vmatprep.subr.bf16.mxu0 %v3588_v8  ;;  %v3596_v13 = vld [vmem:[#allocation2 + $0x284] ss:$16 sps:$4 sm:$0xff]   ;;  %v3599_v15 = vld [vmem:[#allocation2 + $0x280] ss:$16 sps:$4 sm:$0xff]   ;;  %v4306_v7 = vcombine.low %v70_v48, %v70_v48  ;;  %v3736_v48 = vld [vmem:[#allocation2 + $0xcc] ss:$16 sps:$4 sm:$0xff]  }
  0x2e   :  { %1509 = vmatprep.subr.bf16.mxu1 %v3590_v9  ;;  %v3600_v16 = vld [vmem:[#allocation2 + $0x64] ss:$16 sps:$4 sm:$0xff]   ;;  %v3604_v18 = vld [vmem:[#allocation2 + $0x60] ss:$16 sps:$4 sm:$0xff]  }
  0x2f   :  { %v3602_v17 = vld [vmem:[#allocation2 + $0x264] ss:$16 sps:$4 sm:$0xff]   ;;  %v3605_v19 = vld [vmem:[#allocation2 + $0x260] ss:$16 sps:$4 sm:$0xff]  }
  0x30   :  { %1469 = vmatpush1.bf16.msra.mxu0 %v3592_v10  ;;  %v3606_v20 = vld [vmem:[#allocation2 + $0x44] ss:$16 sps:$4 sm:$0xff]   ;;  %v3610_v22 = vld [vmem:[#allocation2 + $0x40] ss:$16 sps:$4 sm:$0xff]  }
  0x31   :  { %1510 = vmatpush1.bf16.msra.mxu1 %v3593_v11  ;;  %1470 = vmatprep.subr.bf16.mxu0 %v3594_v12  ;;  %v3608_v21 = vld [vmem:[#allocation2 + $0x244] ss:$16 sps:$4 sm:$0xff]   ;;  %v3611_v23 = vld [vmem:[#allocation2 + $0x240] ss:$16 sps:$4 sm:$0xff]  }
  0x32   :  { %1511 = vmatprep.subr.bf16.mxu1 %v3596_v13  ;;  %v3612_v24 = vld [vmem:[#allocation2 + $0x24] ss:$16 sps:$4 sm:$0xff]   ;;  %v3616_v26 = vld [vmem:[#allocation2 + $0x20] ss:$16 sps:$4 sm:$0xff]  }
  0x33   :  { %v3614_v25 = vld [vmem:[#allocation2 + $0x224] ss:$16 sps:$4 sm:$0xff]   ;;  %v3617_v27 = vld [vmem:[#allocation2 + $0x220] ss:$16 sps:$4 sm:$0xff]  }
  0x34   :  { %1471 = vmatpush1.bf16.msra.mxu0 %v3598_v14  ;;  %v3618_v28 = vld [vmem:[#allocation2 + $0x4] ss:$16 sps:$4 sm:$0xff]   ;;  %v3622_v30 = vld [vmem:[#allocation2] ss:$16 sps:$4 sm:$0xff]  }
  0x35   :  { %1512 = vmatpush1.bf16.msra.mxu1 %v3599_v15  ;;  %1472 = vmatprep.subr.bf16.mxu0 %v3600_v16  ;;  %v3620_v29 = vld [vmem:[#allocation2 + $0x204] ss:$16 sps:$4 sm:$0xff]   ;;  %v3623_v31 = vld [vmem:[#allocation2 + $0x200] ss:$16 sps:$4 sm:$0xff]   ;;  %v4241_v16 = vmov 0  }
  0x36   :  { %1513 = vmatprep.subr.bf16.mxu1 %v3602_v17  ;;  %v3624_v32 = vld [vmem:[#allocation2 + $0x1e4] ss:$16 sps:$4 sm:$0xff]   ;;  %v3628_v34 = vld [vmem:[#allocation2 + $0x1e0] ss:$16 sps:$4 sm:$0xff]  }
  0x37   :  { %v3626_v33 = vld [vmem:[#allocation2 + $0x3e4] ss:$16 sps:$4 sm:$0xff]   ;;  %v3629_v35 = vld [vmem:[#allocation2 + $0x3e0] ss:$16 sps:$4 sm:$0xff]  }
  0x38   :  { %1473 = vmatpush1.bf16.msra.mxu0 %v3604_v18  ;;  %v3630_v36 = vld [vmem:[#allocation2 + $0x1c4] ss:$16 sps:$4 sm:$0xff]   ;;  %v3634_v38 = vld [vmem:[#allocation2 + $0x1c0] ss:$16 sps:$4 sm:$0xff]  }
  0x39   :  { %1514 = vmatpush1.bf16.msra.mxu1 %v3605_v19  ;;  %1474 = vmatprep.subr.bf16.mxu0 %v3606_v20  ;;  %v3632_v37 = vld [vmem:[#allocation2 + $0x3c4] ss:$16 sps:$4 sm:$0xff]   ;;  %v3635_v39 = vld [vmem:[#allocation2 + $0x3c0] ss:$16 sps:$4 sm:$0xff]  }
  0x3a   :  { %1515 = vmatprep.subr.bf16.mxu1 %v3608_v21  ;;  %v3636_v40 = vld [vmem:[#allocation2 + $0x1a4] ss:$16 sps:$4 sm:$0xff]   ;;  %v3640_v42 = vld [vmem:[#allocation2 + $0x1a0] ss:$16 sps:$4 sm:$0xff]  }
  0x3b   :  { %v3638_v41 = vld [vmem:[#allocation2 + $0x3a4] ss:$16 sps:$4 sm:$0xff]   ;;  %v3641_v43 = vld [vmem:[#allocation2 + $0x3a0] ss:$16 sps:$4 sm:$0xff]  }
  0x3c   :  { %1475 = vmatpush1.bf16.msra.mxu0 %v3610_v22  ;;  %v3642_v44 = vld [vmem:[#allocation2 + $0x184] ss:$16 sps:$4 sm:$0xff]   ;;  %v3646_v49 = vld [vmem:[#allocation2 + $0x180] ss:$16 sps:$4 sm:$0xff]  }
  0x3d   :  { %1516 = vmatpush1.bf16.msra.mxu1 %v3611_v23  ;;  %1476 = vmatprep.subr.bf16.mxu0 %v3612_v24  ;;  %v3644_v45 = vld [vmem:[#allocation2 + $0x384] ss:$16 sps:$4 sm:$0xff]   ;;  %v3647_v50 = vld [vmem:[#allocation2 + $0x380] ss:$16 sps:$4 sm:$0xff]  }
  0x3e   :  { %1517 = vmatprep.subr.bf16.mxu1 %v3614_v25  ;;  %v69_v46 = vld [vmem:[%s4399_s0] sm:$0xff] }
  0x3f   :  { %v4295_v47 = vcombine.high %v69_v46, %v69_v46  ;;  %v3648_v52 = vld [vmem:[#allocation2 + $0x164] ss:$16 sps:$4 sm:$0xff]   ;;  %v3652_v54 = vld [vmem:[#allocation2 + $0x160] ss:$16 sps:$4 sm:$0xff]   ;;  %v4304_v6 = vcombine.low %v69_v46, %v69_v46 }
  0x40   :  { %1477 = vmatpush1.bf16.msra.mxu0 %v3616_v26  ;;  %v3650_v53 = vld [vmem:[#allocation2 + $0x364] ss:$16 sps:$4 sm:$0xff]   ;;  %v3653_v55 = vld [vmem:[#allocation2 + $0x360] ss:$16 sps:$4 sm:$0xff]  }
  0x41   :  { %1518 = vmatpush1.bf16.msra.mxu1 %v3617_v27  ;;  %1478 = vmatprep.subr.bf16.mxu0 %v3618_v28  ;;  %v3654_v56 = vld [vmem:[#allocation2 + $0x144] ss:$16 sps:$4 sm:$0xff]   ;;  %v3658_v58 = vld [vmem:[#allocation2 + $0x140] ss:$16 sps:$4 sm:$0xff]  }
  0x42   :  { %1519 = vmatprep.subr.bf16.mxu1 %v3620_v29  ;;  %1496 = vmatprep.mubr.bf16.mxu0 %v4295_v47  ;;  %v3656_v57 = vld [vmem:[#allocation2 + $0x344] ss:$16 sps:$4 sm:$0xff]   ;;  %v3659_v59 = vld [vmem:[#allocation2 + $0x340] ss:$16 sps:$4 sm:$0xff]  }
  0x43   :  { %v3660_v60 = vld [vmem:[#allocation2 + $0x124] ss:$16 sps:$4 sm:$0xff]   ;;  %v3664_v62 = vld [vmem:[#allocation2 + $0x120] ss:$16 sps:$4 sm:$0xff]  }
  0x44   :  { %1479 = vmatpush1.bf16.msra.mxu0 %v3622_v30  ;;  %v3662_v61 = vld [vmem:[#allocation2 + $0x324] ss:$16 sps:$4 sm:$0xff]   ;;  %v3665_v63 = vld [vmem:[#allocation2 + $0x320] ss:$16 sps:$4 sm:$0xff]  }
  0x45   :  { %1520 = vmatpush1.bf16.msra.mxu1 %v3623_v31  ;;  %1480 = vmatprep.subr.bf16.mxu0 %v3624_v32  ;;  %v3666_v0 = vld [vmem:[#allocation2 + $0x104] ss:$16 sps:$4 sm:$0xff]   ;;  %v3670_v2 = vld [vmem:[#allocation2 + $0x100] ss:$16 sps:$4 sm:$0xff]  }
  0x46   :  { %1521 = vmatprep.subr.bf16.mxu1 %v3626_v33  ;;  %v3668_v1 = vld [vmem:[#allocation2 + $0x304] ss:$16 sps:$4 sm:$0xff]   ;;  %v3671_v3 = vld [vmem:[#allocation2 + $0x300] ss:$16 sps:$4 sm:$0xff]  }
  0x47   :  { %v3678_v4 = vld [vmem:[#allocation2 + $0x4e4] ss:$16 sps:$4 sm:$0xff]   ;;  %v3676_v8 = vld [vmem:[#allocation2 + $0x4e0] ss:$16 sps:$4 sm:$0xff]  }
  0x48   :  { %1481 = vmatpush2.bf16.msra.mxu0 %v3628_v34  ;;  %v3681_v5 = vld [vmem:[#allocation2 + $0x6e4] ss:$16 sps:$4 sm:$0xff]   ;;  %v3679_v9 = vld [vmem:[#allocation2 + $0x6e0] ss:$16 sps:$4 sm:$0xff]  }
  0x49   :  { %1522 = vmatpush2.bf16.msra.mxu1 %v3629_v35  ;;  %1482 = vmatprep.subr.bf16.mxu0 %v3630_v36  ;;  %v3684_v10 = vld [vmem:[#allocation2 + $0x4c4] ss:$16 sps:$4 sm:$0xff]   ;;  %v3682_v12 = vld [vmem:[#allocation2 + $0x4c0] ss:$16 sps:$4 sm:$0xff]  }
  0x4a   :  { %1523 = vmatprep.subr.bf16.mxu1 %v3632_v37  ;;  %v3687_v11 = vld [vmem:[#allocation2 + $0x6c4] ss:$16 sps:$4 sm:$0xff]   ;;  %v3685_v13 = vld [vmem:[#allocation2 + $0x6c0] ss:$16 sps:$4 sm:$0xff]  }
  0x4b   :  { %v3690_v14 = vld [vmem:[#allocation2 + $0x4a4] ss:$16 sps:$4 sm:$0xff]   ;;  %v3688_v17 = vld [vmem:[#allocation2 + $0x4a0] ss:$16 sps:$4 sm:$0xff]  }
  0x4c   :  { %1483 = vmatpush2.bf16.msra.mxu0 %v3634_v38  ;;  %v3693_v15 = vld [vmem:[#allocation2 + $0x6a4] ss:$16 sps:$4 sm:$0xff]   ;;  %v3691_v18 = vld [vmem:[#allocation2 + $0x6a0] ss:$16 sps:$4 sm:$0xff]  }
  0x4d   :  { %1524 = vmatpush2.bf16.msra.mxu1 %v3635_v39  ;;  %1484 = vmatprep.subr.bf16.mxu0 %v3636_v40  ;;  %v3696_v19 = vld [vmem:[#allocation2 + $0x484] ss:$16 sps:$4 sm:$0xff]   ;;  %v3694_v21 = vld [vmem:[#allocation2 + $0x480] ss:$16 sps:$4 sm:$0xff]  }
  0x4e   :  { %1525 = vmatprep.subr.bf16.mxu1 %v3638_v41  ;;  %v3699_v20 = vld [vmem:[#allocation2 + $0x684] ss:$16 sps:$4 sm:$0xff]   ;;  %v3697_v22 = vld [vmem:[#allocation2 + $0x680] ss:$16 sps:$4 sm:$0xff]  }
  0x4f   :  { %v3702_v23 = vld [vmem:[#allocation2 + $0x464] ss:$16 sps:$4 sm:$0xff]   ;;  %v3700_v25 = vld [vmem:[#allocation2 + $0x460] ss:$16 sps:$4 sm:$0xff]  }
  0x50   :  { %1485 = vmatpush2.bf16.msra.mxu0 %v3640_v42  ;;  %v3705_v24 = vld [vmem:[#allocation2 + $0x664] ss:$16 sps:$4 sm:$0xff]   ;;  %v3703_v26 = vld [vmem:[#allocation2 + $0x660] ss:$16 sps:$4 sm:$0xff]   ;;  %v3730_v42 = vld [vmem:[#allocation2 + $0xec] ss:$16 sps:$4 sm:$0xff]  }
  0x51   :  { %1526 = vmatpush2.bf16.msra.mxu1 %v3641_v43  ;;  %1486 = vmatprep.subr.bf16.mxu0 %v3642_v44  ;;  %v3708_v27 = vld [vmem:[#allocation2 + $0x444] ss:$16 sps:$4 sm:$0xff]   ;;  %v3706_v29 = vld [vmem:[#allocation2 + $0x440] ss:$16 sps:$4 sm:$0xff]   ;;  %v3727_v44 = vld [vmem:[%s4399_s0 + $0x18] ss:$0 sps:$4 sm:$0xff]  }
  0x52   :  { %1527 = vmatprep.subr.bf16.mxu1 %v3644_v45  ;;  %v3711_v28 = vld [vmem:[#allocation2 + $0x644] ss:$16 sps:$4 sm:$0xff]   ;;  %v3709_v30 = vld [vmem:[#allocation2 + $0x640] ss:$16 sps:$4 sm:$0xff]   ;;  %v3728_v45 = vld [vmem:[#allocation2 + $0xe8] ss:$16 sps:$4 sm:$0xff]  }
  0x53   :  { %v3714_v31 = vld [vmem:[#allocation2 + $0x424] ss:$16 sps:$4 sm:$0xff]   ;;  %v3712_v34 = vld [vmem:[#allocation2 + $0x420] ss:$16 sps:$4 sm:$0xff]  }
  0x54   :  { %1487 = vmatpush2.bf16.msra.mxu0 %v3646_v49  ;;  %v3717_v32 = vld [vmem:[#allocation2 + $0x624] ss:$16 sps:$4 sm:$0xff]   ;;  %v3715_v36 = vld [vmem:[#allocation2 + $0x620] ss:$16 sps:$4 sm:$0xff]  }
  0x55   :  { %1528 = vmatpush2.bf16.msra.mxu1 %v3647_v50  ;;  %1488 = vmatprep.subr.bf16.mxu0 %v3648_v52  ;;  %v4314_v33 = vld [vmem:[%s4399_s0 + $0x10] sm:$0xff]  ;;  %v3734_v50 = vld [vmem:[#allocation2 + $0xc8] ss:$16 sps:$4 sm:$0xff]  }
  0x56   :  { %1529 = vmatprep.subr.bf16.mxu1 %v3650_v53  ;;  %v4318_v35 = vcombine.high %v4314_v33, %v4314_v33  ;;  %v3720_v37 = vld [vmem:[#allocation2 + $0x404] ss:$16 sps:$4 sm:$0xff]   ;;  %v3718_v39 = vld [vmem:[#allocation2 + $0x400] ss:$16 sps:$4 sm:$0xff]   ;;  %v3742_v53 = vld [vmem:[#allocation2 + $0xac] ss:$16 sps:$4 sm:$0xff]  }
  0x57   :  { %v3723_v38 = vld [vmem:[#allocation2 + $0x604] ss:$16 sps:$4 sm:$0xff]   ;;  %v3721_v40 = vld [vmem:[#allocation2 + $0x600] ss:$16 sps:$4 sm:$0xff]  }
  0x58   :  { %1489 = vmatpush2.bf16.msra.mxu0 %v3652_v54  ;;  %v3726_v41 = vld [vmem:[#allocation2 + $0x5e4] ss:$16 sps:$4 sm:$0xff]   ;;  %v3724_v43 = vld [vmem:[#allocation2 + $0x5e0] ss:$16 sps:$4 sm:$0xff]  }
  0x59   :  { %1530 = vmatpush2.bf16.msra.mxu1 %v3653_v55  ;;  %1490 = vmatprep.subr.bf16.mxu0 %v3654_v56  ;;  %v3733_v46 = vld [vmem:[#allocation2 + $0x5c4] ss:$16 sps:$4 sm:$0xff]   ;;  %v3731_v49 = vld [vmem:[#allocation2 + $0x5c0] ss:$16 sps:$4 sm:$0xff]   ;;  %v3740_v55 = vld [vmem:[#allocation2 + $0xa8] ss:$16 sps:$4 sm:$0xff]  }
  0x5a   :  { %1531 = vmatprep.subr.bf16.mxu1 %v3656_v57  ;;  %v3739_v52 = vld [vmem:[#allocation2 + $0x5a4] ss:$16 sps:$4 sm:$0xff]   ;;  %v3737_v54 = vld [vmem:[#allocation2 + $0x5a0] ss:$16 sps:$4 sm:$0xff]   ;;  %v3748_v57 = vld [vmem:[#allocation2 + $0x8c] ss:$16 sps:$4 sm:$0xff]  }
  0x5b   :  { %v3745_v56 = vld [vmem:[#allocation2 + $0x584] ss:$16 sps:$4 sm:$0xff]  }
  0x5c   :  { %1491 = vmatpush2.bf16.msra.mxu0 %v3658_v58  ;;  %v3743_v58 = vld [vmem:[#allocation2 + $0x580] ss:$16 sps:$4 sm:$0xff]  }
  0x5d   :  { %1532 = vmatpush2.bf16.msra.mxu1 %v3659_v59  ;;  %1492 = vmatprep.subr.bf16.mxu0 %v3660_v60  ;;  %v3746_v59 = vld [vmem:[#allocation2 + $0x88] ss:$16 sps:$4 sm:$0xff]   ;;  %v3751_v60 = vld [vmem:[#allocation2 + $0x564] ss:$16 sps:$4 sm:$0xff]  }
  0x5e   :  { %1533 = vmatprep.subr.bf16.mxu1 %v3662_v61  ;;  %v3754_v61 = vld [vmem:[#allocation2 + $0x6c] ss:$16 sps:$4 sm:$0xff]  }
  0x60   :  { %1493 = vmatpush2.bf16.msra.mxu0 %v3664_v62  ;;  %v3749_v62 = vld [vmem:[#allocation2 + $0x560] ss:$16 sps:$4 sm:$0xff]  }
  0x61   :  { %1534 = vmatpush2.bf16.msra.mxu1 %v3665_v63  ;;  %1494 = vmatprep.subr.bf16.mxu0 %v3666_v0  ;;  %v3757_v63 = vld [vmem:[#allocation2 + $0x544] ss:$16 sps:$4 sm:$0xff]   ;;  %v3760_v0 = vld [vmem:[#allocation2 + $0x4c] ss:$16 sps:$4 sm:$0xff]  }
  0x62   :  { %1535 = vmatprep.subr.bf16.mxu1 %v3668_v1  ;;  %v3755_v1 = vld [vmem:[#allocation2 + $0x540] ss:$16 sps:$4 sm:$0xff]  }
  0x64   :  { %1495 = vmatpush2.bf16.msra.mxu0 %v3670_v2  ;;  %v3758_v2 = vld [vmem:[#allocation2 + $0x48] ss:$16 sps:$4 sm:$0xff]  }
  0x65   :  { %1536 = vmatpush2.bf16.msra.mxu1 %v3671_v3  ;;  %1546 = vmatprep.subr.bf16.mxu0 %v3678_v4  ;;  %v3763_v3 = vld [vmem:[#allocation2 + $0x524] ss:$16 sps:$4 sm:$0xff]   ;;  %v3766_v4 = vld [vmem:[#allocation2 + $0x2c] ss:$16 sps:$4 sm:$0xff]  }
  0x66   :  { %1587 = vmatprep.subr.bf16.mxu1 %v3681_v5  ;;  %v3761_v5 = vld [vmem:[#allocation2 + $0x520] ss:$16 sps:$4 sm:$0xff]  }
  0x67   :  { %1497 = vmatmul.mubr.bf16.vlgmr.msra.gmra.mxu0 %v4304_v6 }
  0x68   :  { %1538 = vmatmul.mubr.bf16.vlgmr.msra.gmra.mxu1 %v4306_v7  ;;  %1547 = vmatpush1.bf16.msra.mxu0 %v3676_v8  ;;  %v3764_v8 = vld [vmem:[#allocation2 + $0x28] ss:$16 sps:$4 sm:$0xff]  }
  0x69   :  { %1588 = vmatpush1.bf16.msra.mxu1 %v3679_v9  ;;  %1548 = vmatprep.subr.bf16.mxu0 %v3684_v10  ;;  %v3769_v9 = vld [vmem:[#allocation2 + $0x504] ss:$16 sps:$4 sm:$0xff]   ;;  %v3772_v10 = vld [vmem:[#allocation2 + $0xc] ss:$16 sps:$4 sm:$0xff]  }
  0x6a   :  { %1589 = vmatprep.subr.bf16.mxu1 %v3687_v11  ;;  %1619 = vmatprep.mubr.bf16.mxu1 %v4241_v16  ;;  %v3767_v11 = vld [vmem:[#allocation2 + $0x500] ss:$16 sps:$4 sm:$0xff]  }
  0x6b   :  { %1578 = vmatprep.mubr.bf16.mxu0 %v4318_v35 }
  0x6c   :  { %1549 = vmatpush1.bf16.msra.mxu0 %v3682_v12  ;;  %v3770_v12 = vld [vmem:[#allocation2 + $0x8] ss:$16 sps:$4 sm:$0xff]  }
  0x6d   :  { %1590 = vmatpush1.bf16.msra.mxu1 %v3685_v13  ;;  %1550 = vmatprep.subr.bf16.mxu0 %v3690_v14  ;;  %v3777_v13 = vld [vmem:[#allocation2 + $0x1ec] ss:$16 sps:$4 sm:$0xff]  }
  0x6e   :  { %1591 = vmatprep.subr.bf16.mxu1 %v3693_v15  ;;  %v3780_v14 = vld [vmem:[#allocation2 + $0x2ec] ss:$16 sps:$4 sm:$0xff]   ;;  %v4327_v15 = vcombine.low %v4314_v33, %v4314_v33  ;;  %v3799_v33 = vld [vmem:[#allocation2 + $0x168] ss:$16 sps:$4 sm:$0xff]  }
  0x70   :  { %1551 = vmatpush1.bf16.msra.mxu0 %v3688_v17  ;;  %v3775_v17 = vld [vmem:[#allocation2 + $0x1e8] ss:$16 sps:$4 sm:$0xff]  }
  0x71   :  { %1592 = vmatpush1.bf16.msra.mxu1 %v3691_v18  ;;  %1552 = vmatprep.subr.bf16.mxu0 %v3696_v19  ;;  %v3778_v18 = vld [vmem:[#allocation2 + $0x2e8] ss:$16 sps:$4 sm:$0xff]   ;;  %v3783_v19 = vld [vmem:[#allocation2 + $0x1cc] ss:$16 sps:$4 sm:$0xff]  }
  0x72   :  { %1593 = vmatprep.subr.bf16.mxu1 %v3699_v20  ;;  %v3786_v20 = vld [vmem:[#allocation2 + $0x2cc] ss:$16 sps:$4 sm:$0xff]  }
  0x74   :  { %1553 = vmatpush1.bf16.msra.mxu0 %v3694_v21  ;;  %v3781_v21 = vld [vmem:[#allocation2 + $0x1c8] ss:$16 sps:$4 sm:$0xff]  }
  0x75   :  { %1594 = vmatpush1.bf16.msra.mxu1 %v3697_v22  ;;  %1554 = vmatprep.subr.bf16.mxu0 %v3702_v23  ;;  %v3784_v22 = vld [vmem:[#allocation2 + $0x2c8] ss:$16 sps:$4 sm:$0xff]   ;;  %v3789_v23 = vld [vmem:[#allocation2 + $0x1ac] ss:$16 sps:$4 sm:$0xff]  }
  0x76   :  { %1595 = vmatprep.subr.bf16.mxu1 %v3705_v24  ;;  %v3792_v24 = vld [vmem:[#allocation2 + $0x2ac] ss:$16 sps:$4 sm:$0xff]  }
  0x78   :  { %1555 = vmatpush1.bf16.msra.mxu0 %v3700_v25  ;;  %v3787_v25 = vld [vmem:[#allocation2 + $0x1a8] ss:$16 sps:$4 sm:$0xff]  }
  0x79   :  { %1596 = vmatpush1.bf16.msra.mxu1 %v3703_v26  ;;  %1556 = vmatprep.subr.bf16.mxu0 %v3708_v27  ;;  %v3790_v26 = vld [vmem:[#allocation2 + $0x2a8] ss:$16 sps:$4 sm:$0xff]   ;;  %v3795_v27 = vld [vmem:[#allocation2 + $0x18c] ss:$16 sps:$4 sm:$0xff]  }
  0x7a   :  { %1597 = vmatprep.subr.bf16.mxu1 %v3711_v28  ;;  %v3798_v28 = vld [vmem:[#allocation2 + $0x28c] ss:$16 sps:$4 sm:$0xff]  }
  0x7c   :  { %1557 = vmatpush1.bf16.msra.mxu0 %v3706_v29  ;;  %v3793_v29 = vld [vmem:[#allocation2 + $0x188] ss:$16 sps:$4 sm:$0xff]  }
  0x7d   :  { %1598 = vmatpush1.bf16.msra.mxu1 %v3709_v30  ;;  %1558 = vmatprep.subr.bf16.mxu0 %v3714_v31  ;;  %v3796_v30 = vld [vmem:[#allocation2 + $0x288] ss:$16 sps:$4 sm:$0xff]   ;;  %v3801_v31 = vld [vmem:[#allocation2 + $0x16c] ss:$16 sps:$4 sm:$0xff]  }
  0x7e   :  { %1599 = vmatprep.subr.bf16.mxu1 %v3717_v32  ;;  %v3804_v32 = vld [vmem:[#allocation2 + $0x26c] ss:$16 sps:$4 sm:$0xff]  }
  0x80   :  { %1559 = vmatpush1.bf16.msra.mxu0 %v3712_v34  ;;  %v3807_v34 = vld [vmem:[#allocation2 + $0x14c] ss:$16 sps:$4 sm:$0xff]  }
  0x81   :  { %1600 = vmatpush1.bf16.msra.mxu1 %v3715_v36  ;;  %1560 = vmatprep.subr.bf16.mxu0 %v3720_v37  ;;  %v3810_v36 = vld [vmem:[#allocation2 + $0x24c] ss:$16 sps:$4 sm:$0xff]   ;;  %v3805_v37 = vld [vmem:[#allocation2 + $0x148] ss:$16 sps:$4 sm:$0xff]  }
  0x82   :  { %1601 = vmatprep.subr.bf16.mxu1 %v3723_v38  ;;  %v3808_v38 = vld [vmem:[#allocation2 + $0x248] ss:$16 sps:$4 sm:$0xff]  }
  0x84   :  { %1561 = vmatpush1.bf16.msra.mxu0 %v3718_v39  ;;  %v3813_v39 = vld [vmem:[#allocation2 + $0x12c] ss:$16 sps:$4 sm:$0xff]  }
  0x85   :  { %1602 = vmatpush1.bf16.msra.mxu1 %v3721_v40  ;;  %1562 = vmatprep.subr.bf16.mxu0 %v3726_v41  ;;  %v3816_v40 = vld [vmem:[#allocation2 + $0x22c] ss:$16 sps:$4 sm:$0xff]   ;;  %v3811_v41 = vld [vmem:[#allocation2 + $0x128] ss:$16 sps:$4 sm:$0xff]  }
  0x86   :  { %1628 = vmatprep.subr.bf16.mxu1 %v3730_v42  ;;  %v3814_v42 = vld [vmem:[#allocation2 + $0x228] ss:$16 sps:$4 sm:$0xff]  }
  0x88   :  { %1620 = vmatmul.mubr.bf16.vlgmr.msra.gmra.mxu1 %v3727_v44  ;;  %1563 = vmatpush2.bf16.msra.mxu0 %v3724_v43  ;;  %v3819_v43 = vld [vmem:[#allocation2 + $0x10c] ss:$16 sps:$4 sm:$0xff]  }
  0x89   :  { %1629 = vmatpush1.bf16.msra.mxu1 %v3728_v45  ;;  %1564 = vmatprep.subr.bf16.mxu0 %v3733_v46  ;;  %v3822_v44 = vld [vmem:[#allocation2 + $0x20c] ss:$16 sps:$4 sm:$0xff]   ;;  %v3817_v45 = vld [vmem:[#allocation2 + $0x108] ss:$16 sps:$4 sm:$0xff]  }
  0x8a   :  { %1630 = vmatprep.subr.bf16.mxu1 %v3736_v48  ;;  %1660 = vmatprep.mubr.bf16.mxu1 %v4295_v47  ;;  %v3752_v47 = vld [vmem:[#allocation2 + $0x68] ss:$16 sps:$4 sm:$0xff]   ;;  %v3825_v48 = vld [vmem:[#allocation2 + $0x3ec] ss:$16 sps:$4 sm:$0xff]  }
  0x8b   :  { %v3820_v46 = vld [vmem:[#allocation2 + $0x208] ss:$16 sps:$4 sm:$0xff]  }
  0x8c   :  { %1565 = vmatpush2.bf16.msra.mxu0 %v3731_v49  ;;  %v3828_v49 = vld [vmem:[#allocation2 + $0x4ec] ss:$16 sps:$4 sm:$0xff]  }
  0x8d   :  { %1631 = vmatpush1.bf16.msra.mxu1 %v3734_v50  ;;  %1566 = vmatprep.subr.bf16.mxu0 %v3739_v52  ;;  %v3823_v50 = vld [vmem:[#allocation2 + $0x3e8] ss:$16 sps:$4 sm:$0xff]  }
  0x8e   :  { %1632 = vmatprep.subr.bf16.mxu1 %v3742_v53  ;;  %v3826_v52 = vld [vmem:[#allocation2 + $0x4e8] ss:$16 sps:$4 sm:$0xff]   ;;  %v3831_v53 = vld [vmem:[#allocation2 + $0x3cc] ss:$16 sps:$4 sm:$0xff]  }
  0x90   :  { %1567 = vmatpush2.bf16.msra.mxu0 %v3737_v54  ;;  %v3834_v54 = vld [vmem:[#allocation2 + $0x4cc] ss:$16 sps:$4 sm:$0xff]  }
  0x91   :  { %1633 = vmatpush1.bf16.msra.mxu1 %v3740_v55  ;;  %1568 = vmatprep.subr.bf16.mxu0 %v3745_v56  ;;  %v3829_v55 = vld [vmem:[#allocation2 + $0x3c8] ss:$16 sps:$4 sm:$0xff]  }
  0x92   :  { %1634 = vmatprep.subr.bf16.mxu1 %v3748_v57  ;;  %v3832_v56 = vld [vmem:[#allocation2 + $0x4c8] ss:$16 sps:$4 sm:$0xff]   ;;  %v3837_v57 = vld [vmem:[#allocation2 + $0x3ac] ss:$16 sps:$4 sm:$0xff]  }
  0x94   :  { %1569 = vmatpush2.bf16.msra.mxu0 %v3743_v58  ;;  %v3840_v58 = vld [vmem:[#allocation2 + $0x4ac] ss:$16 sps:$4 sm:$0xff]  }
  0x95   :  { %1635 = vmatpush1.bf16.msra.mxu1 %v3746_v59  ;;  %1570 = vmatprep.subr.bf16.mxu0 %v3751_v60  ;;  %v3835_v59 = vld [vmem:[#allocation2 + $0x3a8] ss:$16 sps:$4 sm:$0xff]  }
  0x96   :  { %1636 = vmatprep.subr.bf16.mxu1 %v3754_v61  ;;  %v3838_v60 = vld [vmem:[#allocation2 + $0x4a8] ss:$16 sps:$4 sm:$0xff]   ;;  %v3843_v61 = vld [vmem:[#allocation2 + $0x38c] ss:$16 sps:$4 sm:$0xff]  }
  0x98   :  { %1571 = vmatpush2.bf16.msra.mxu0 %v3749_v62  ;;  %v3846_v62 = vld [vmem:[#allocation2 + $0x48c] ss:$16 sps:$4 sm:$0xff]  }
  0x99   :  { %1637 = vmatpush1.bf16.msra.mxu1 %v3752_v47  ;;  %1572 = vmatprep.subr.bf16.mxu0 %v3757_v63  ;;  %v3841_v47 = vld [vmem:[#allocation2 + $0x388] ss:$16 sps:$4 sm:$0xff]   ;;  %v3849_v63 = vld [vmem:[#allocation2 + $0x36c] ss:$16 sps:$4 sm:$0xff]  }
  0x9a   :  { %1638 = vmatprep.subr.bf16.mxu1 %v3760_v0  ;;  %v3852_v0 = vld [vmem:[#allocation2 + $0x46c] ss:$16 sps:$4 sm:$0xff]  }
  0x9c   :  { %1573 = vmatpush2.bf16.msra.mxu0 %v3755_v1  ;;  %v3847_v1 = vld [vmem:[#allocation2 + $0x368] ss:$16 sps:$4 sm:$0xff]  }
  0x9d   :  { %1639 = vmatpush1.bf16.msra.mxu1 %v3758_v2  ;;  %1574 = vmatprep.subr.bf16.mxu0 %v3763_v3  ;;  %v3850_v2 = vld [vmem:[#allocation2 + $0x468] ss:$16 sps:$4 sm:$0xff]   ;;  %v3855_v3 = vld [vmem:[#allocation2 + $0x34c] ss:$16 sps:$4 sm:$0xff]  }
  0x9e   :  { %1640 = vmatprep.subr.bf16.mxu1 %v3766_v4  ;;  %v3858_v4 = vld [vmem:[#allocation2 + $0x44c] ss:$16 sps:$4 sm:$0xff]  }
  0xa0   :  { %1575 = vmatpush2.bf16.msra.mxu0 %v3761_v5  ;;  %v3856_v5 = vld [vmem:[#allocation2 + $0x448] ss:$16 sps:$4 sm:$0xff]  }
  0xa1   :  { %1641 = vmatpush1.bf16.msra.mxu1 %v3764_v8  ;;  %1576 = vmatprep.subr.bf16.mxu0 %v3769_v9  ;;  %v3861_v8 = vld [vmem:[#allocation2 + $0x32c] ss:$16 sps:$4 sm:$0xff]  }
  0xa2   :  { %1642 = vmatprep.subr.bf16.mxu1 %v3772_v10  ;;  %v3864_v9 = vld [vmem:[#allocation2 + $0x42c] ss:$16 sps:$4 sm:$0xff]   ;;  %v3859_v10 = vld [vmem:[#allocation2 + $0x328] ss:$16 sps:$4 sm:$0xff]  }
  0xa4   :  { %1577 = vmatpush2.bf16.msra.mxu0 %v3767_v11  ;;  %v3862_v11 = vld [vmem:[#allocation2 + $0x428] ss:$16 sps:$4 sm:$0xff]  }
  0xa5   :  { %1643 = vmatpush1.bf16.msra.mxu1 %v3770_v12  ;;  %1669 = vmatprep.subr.bf16.mxu0 %v3780_v14  ;;  %v3867_v12 = vld [vmem:[#allocation2 + $0x30c] ss:$16 sps:$4 sm:$0xff]   ;;  %v3865_v14 = vld [vmem:[#allocation2 + $0x308] ss:$16 sps:$4 sm:$0xff]  }
  0xa6   :  { %1644 = vmatprep.subr.bf16.mxu1 %v3777_v13  ;;  %v3870_v13 = vld [vmem:[#allocation2 + $0x40c] ss:$16 sps:$4 sm:$0xff]  }
  0xa7   :  { %1579 = vmatmul.mubr.bf16.vlgmr.msra.gmra.mxu0 %v4327_v15 }
  0xa8   :  { %1670 = vmatpush1.bf16.msra.mxu0 %v3778_v18  ;;  %1701 = vmatprep.mubr.bf16.mxu0 %v4300_v51  ;;  %v3802_v51 = vld [vmem:[#allocation2 + $0x268] ss:$16 sps:$4 sm:$0xff]   ;;  %v3873_v18 = vld [vmem:[#allocation2 + $0x5ec] ss:$16 sps:$4 sm:$0xff]  }
  0xa9   :  { %1645 = vmatpush2.bf16.msra.mxu1 %v3775_v17  ;;  %1671 = vmatprep.subr.bf16.mxu0 %v3786_v20  ;;  %v3868_v17 = vld [vmem:[#allocation2 + $0x408] ss:$16 sps:$4 sm:$0xff]  }
  0xaa   :  { %1646 = vmatprep.subr.bf16.mxu1 %v3783_v19  ;;  %v3876_v19 = vld [vmem:[#allocation2 + $0x6ec] ss:$16 sps:$4 sm:$0xff]   ;;  %v3871_v20 = vld [vmem:[#allocation2 + $0x5e8] ss:$16 sps:$4 sm:$0xff]  }
  0xac   :  { %1672 = vmatpush1.bf16.msra.mxu0 %v3784_v22  ;;  %v3879_v22 = vld [vmem:[#allocation2 + $0x5cc] ss:$16 sps:$4 sm:$0xff]  }
  0xad   :  { %1647 = vmatpush2.bf16.msra.mxu1 %v3781_v21  ;;  %1673 = vmatprep.subr.bf16.mxu0 %v3792_v24  ;;  %v3874_v21 = vld [vmem:[#allocation2 + $0x6e8] ss:$16 sps:$4 sm:$0xff]  }
  0xae   :  { %1648 = vmatprep.subr.bf16.mxu1 %v3789_v23  ;;  %v3882_v23 = vld [vmem:[#allocation2 + $0x6cc] ss:$16 sps:$4 sm:$0xff]   ;;  %v3877_v24 = vld [vmem:[#allocation2 + $0x5c8] ss:$16 sps:$4 sm:$0xff]  }
  0xb0   :  { %1674 = vmatpush1.bf16.msra.mxu0 %v3790_v26  ;;  %v3885_v26 = vld [vmem:[#allocation2 + $0x5ac] ss:$16 sps:$4 sm:$0xff]  }
  0xb1   :  { %1649 = vmatpush2.bf16.msra.mxu1 %v3787_v25  ;;  %1675 = vmatprep.subr.bf16.mxu0 %v3798_v28  ;;  %v3880_v25 = vld [vmem:[#allocation2 + $0x6c8] ss:$16 sps:$4 sm:$0xff]  }
  0xb2   :  { %1650 = vmatprep.subr.bf16.mxu1 %v3795_v27  ;;  %v3888_v27 = vld [vmem:[#allocation2 + $0x6ac] ss:$16 sps:$4 sm:$0xff]   ;;  %v3883_v28 = vld [vmem:[#allocation2 + $0x5a8] ss:$16 sps:$4 sm:$0xff]  }
  0xb4   :  { %1676 = vmatpush1.bf16.msra.mxu0 %v3796_v30  ;;  %v3891_v30 = vld [vmem:[#allocation2 + $0x58c] ss:$16 sps:$4 sm:$0xff]  }
  0xb5   :  { %1651 = vmatpush2.bf16.msra.mxu1 %v3793_v29  ;;  %1677 = vmatprep.subr.bf16.mxu0 %v3804_v32  ;;  %v3886_v29 = vld [vmem:[#allocation2 + $0x6a8] ss:$16 sps:$4 sm:$0xff]  }
  0xb6   :  { %1652 = vmatprep.subr.bf16.mxu1 %v3801_v31  ;;  %v3894_v31 = vld [vmem:[#allocation2 + $0x68c] ss:$16 sps:$4 sm:$0xff]   ;;  %v3889_v32 = vld [vmem:[#allocation2 + $0x588] ss:$16 sps:$4 sm:$0xff]  }
  0xb8   :  { %1678 = vmatpush1.bf16.msra.mxu0 %v3802_v51  ;;  %v3900_v51 = vld [vmem:[#allocation2 + $0x66c] ss:$16 sps:$4 sm:$0xff]  }
  0xb9   :  { %1653 = vmatpush2.bf16.msra.mxu1 %v3799_v33  ;;  %1679 = vmatprep.subr.bf16.mxu0 %v3810_v36  ;;  %v3892_v33 = vld [vmem:[#allocation2 + $0x688] ss:$16 sps:$4 sm:$0xff]  }
  0xba   :  { %1654 = vmatprep.subr.bf16.mxu1 %v3807_v34  ;;  %v3895_v34 = vld [vmem:[#allocation2 + $0x568] ss:$16 sps:$4 sm:$0xff]  }
  0xbb   :  { %v3898_v36 = vld [vmem:[#allocation2 + $0x668] ss:$16 sps:$4 sm:$0xff]  }
  0xbc   :  { %1680 = vmatpush1.bf16.msra.mxu0 %v3808_v38  ;;  %v3901_v38 = vld [vmem:[#allocation2 + $0x548] ss:$16 sps:$4 sm:$0xff]  }
  0xbd   :  { %1655 = vmatpush2.bf16.msra.mxu1 %v3805_v37  ;;  %1681 = vmatprep.subr.bf16.mxu0 %v3816_v40  ;;  %v3903_v37 = vld [vmem:[#allocation2 + $0x54c] ss:$16 sps:$4 sm:$0xff]  }
  0xbe   :  { %1656 = vmatprep.subr.bf16.mxu1 %v3813_v39  ;;  %v3904_v39 = vld [vmem:[#allocation2 + $0x648] ss:$16 sps:$4 sm:$0xff]   ;;  %v3909_v40 = vld [vmem:[#allocation2 + $0x52c] ss:$16 sps:$4 sm:$0xff]  }
  0xc0   :  { %1682 = vmatpush1.bf16.msra.mxu0 %v3814_v42  ;;  %v3907_v42 = vld [vmem:[#allocation2 + $0x528] ss:$16 sps:$4 sm:$0xff]  }
  0xc1   :  { %1657 = vmatpush2.bf16.msra.mxu1 %v3811_v41  ;;  %1683 = vmatprep.subr.bf16.mxu0 %v3822_v44  ;;  %v3912_v41 = vld [vmem:[#allocation2 + $0x62c] ss:$16 sps:$4 sm:$0xff]  }
  0xc2   :  { %1658 = vmatprep.subr.bf16.mxu1 %v3819_v43  ;;  %v3910_v43 = vld [vmem:[#allocation2 + $0x628] ss:$16 sps:$4 sm:$0xff]   ;;  %v3915_v44 = vld [vmem:[#allocation2 + $0x50c] ss:$16 sps:$4 sm:$0xff]  }
  0xc4   :  { %1684 = vmatpush1.bf16.msra.mxu0 %v3820_v46  ;;  %v3913_v46 = vld [vmem:[#allocation2 + $0x508] ss:$16 sps:$4 sm:$0xff]  }
  0xc5   :  { %1659 = vmatpush2.bf16.msra.mxu1 %v3817_v45  ;;  %1685 = vmatprep.subr.bf16.mxu0 %v3825_v48  ;;  %v3918_v45 = vld [vmem:[#allocation2 + $0x60c] ss:$16 sps:$4 sm:$0xff]   ;;  %v3916_v48 = vld [vmem:[#allocation2 + $0x608] ss:$16 sps:$4 sm:$0xff]  }
  0xc6   :  { %1710 = vmatprep.subr.bf16.mxu1 %v3828_v49  ;;  %v3921_v49 = vld [vmem:[#allocation5 + $0xe4] ss:$16 sps:$4 sm:$0xff]  }
  0xc8   :  { %1661 = vmatmul.mubr.bf16.vlgmr.msra.gmra.mxu1 %v4304_v6  ;;  %1686 = vmatpush2.bf16.msra.mxu0 %v3823_v50  ;;  %v3844_v6 = vld [vmem:[#allocation2 + $0x488] ss:$16 sps:$4 sm:$0xff]   ;;  %v3919_v50 = vld [vmem:[#allocation5 + $0xe0] ss:$16 sps:$4 sm:$0xff]  }
  0xc9   :  { %1711 = vmatpush1.bf16.msra.mxu1 %v3826_v52  ;;  %1687 = vmatprep.subr.bf16.mxu0 %v3831_v53  ;;  %v3924_v52 = vld [vmem:[#allocation5 + $0xc4] ss:$16 sps:$4 sm:$0xff]   ;;  %v4147_v53 = vld [vmem:[%s4399_s0 + $0x18] ss:$0 sps:$4 sm:$0xff]  }
  0xca   :  { %1712 = vmatprep.subr.bf16.mxu1 %v3834_v54  ;;  %1742 = vmatprep.mubr.bf16.mxu1 %v4318_v35  ;;  %v3853_v35 = vld [vmem:[#allocation2 + $0x348] ss:$16 sps:$4 sm:$0xff]   ;;  %v3922_v54 = vld [vmem:[#allocation5 + $0xc0] ss:$16 sps:$4 sm:$0xff]  }
  0xcc   :  { %1688 = vmatpush2.bf16.msra.mxu0 %v3829_v55  ;;  %v3927_v55 = vld [vmem:[#allocation5 + $0xa4] ss:$16 sps:$4 sm:$0xff]  }
  0xcd   :  { %1713 = vmatpush1.bf16.msra.mxu1 %v3832_v56  ;;  %1689 = vmatprep.subr.bf16.mxu0 %v3837_v57  ;;  %v3925_v56 = vld [vmem:[#allocation5 + $0xa0] ss:$16 sps:$4 sm:$0xff]   ;;  %v3930_v57 = vld [vmem:[#allocation5 + $0x84] ss:$16 sps:$4 sm:$0xff]  }
  0xce   :  { %1714 = vmatprep.subr.bf16.mxu1 %v3840_v58  ;;  %v3928_v58 = vld [vmem:[#allocation5 + $0x80] ss:$16 sps:$4 sm:$0xff]  }
  0xd0   :  { %1690 = vmatpush2.bf16.msra.mxu0 %v3835_v59  ;;  %v3991_v59 = vld [vmem:[#allocation5 + $0x2e0] ss:$16 sps:$4 sm:$0xff]  }
  0xd1   :  { %1715 = vmatpush1.bf16.msra.mxu1 %v3838_v60  ;;  %1691 = vmatprep.subr.bf16.mxu0 %v3843_v61  ;;  %v3993_v60 = vld [vmem:[#allocation5 + $0x2e4] ss:$16 sps:$4 sm:$0xff]  }
  0xd2   :  { %1716 = vmatprep.subr.bf16.mxu1 %v3846_v62  ;;  %v3933_v61 = vld [vmem:[#allocation5 + $0x64] ss:$16 sps:$4 sm:$0xff]   ;;  %v3997_v62 = vld [vmem:[#allocation5 + $0x2c0] ss:$16 sps:$4 sm:$0xff]  }
  0xd4   :  { %1692 = vmatpush2.bf16.msra.mxu0 %v3841_v47  ;;  %v3999_v47 = vld [vmem:[#allocation5 + $0x2c4] ss:$16 sps:$4 sm:$0xff]  }
  0xd5   :  { %1717 = vmatpush1.bf16.msra.mxu1 %v3844_v6  ;;  %1693 = vmatprep.subr.bf16.mxu0 %v3849_v63  ;;  %v3936_v6 = vld [vmem:[#allocation5 + $0x44] ss:$16 sps:$4 sm:$0xff]   ;;  %v3934_v63 = vld [vmem:[#allocation5 + $0x40] ss:$16 sps:$4 sm:$0xff]  }
  0xd6   :  { %1718 = vmatprep.subr.bf16.mxu1 %v3852_v0  ;;  %v4003_v0 = vld [vmem:[#allocation5 + $0x2a0] ss:$16 sps:$4 sm:$0xff]  }
  0xd8   :  { %1694 = vmatpush2.bf16.msra.mxu0 %v3847_v1  ;;  %v4005_v1 = vld [vmem:[#allocation5 + $0x2a4] ss:$16 sps:$4 sm:$0xff]  }
  0xd9   :  { %1719 = vmatpush1.bf16.msra.mxu1 %v3850_v2  ;;  %1695 = vmatprep.subr.bf16.mxu0 %v3855_v3  ;;  %v3939_v2 = vld [vmem:[#allocation5 + $0x24] ss:$16 sps:$4 sm:$0xff]   ;;  %v3937_v3 = vld [vmem:[#allocation5 + $0x20] ss:$16 sps:$4 sm:$0xff]  }
  0xda   :  { %1720 = vmatprep.subr.bf16.mxu1 %v3858_v4  ;;  %v4009_v4 = vld [vmem:[#allocation5 + $0x280] ss:$16 sps:$4 sm:$0xff]  }
  0xdc   :  { %1696 = vmatpush2.bf16.msra.mxu0 %v3853_v35  ;;  %v4011_v35 = vld [vmem:[#allocation5 + $0x284] ss:$16 sps:$4 sm:$0xff]  }
  0xdd   :  { %1721 = vmatpush1.bf16.msra.mxu1 %v3856_v5  ;;  %1697 = vmatprep.subr.bf16.mxu0 %v3861_v8  ;;  %v3942_v5 = vld [vmem:[#allocation5 + $0x4] ss:$16 sps:$4 sm:$0xff]   ;;  %v3940_v8 = vld [vmem:[#allocation5] ss:$16 sps:$4 sm:$0xff]  }
  0xde   :  { %1722 = vmatprep.subr.bf16.mxu1 %v3864_v9  ;;  %v4015_v9 = vld [vmem:[#allocation5 + $0x260] ss:$16 sps:$4 sm:$0xff]  }
  0xe0   :  { %1698 = vmatpush2.bf16.msra.mxu0 %v3859_v10  ;;  %v4017_v10 = vld [vmem:[#allocation5 + $0x264] ss:$16 sps:$4 sm:$0xff]  }
  0xe1   :  { %1723 = vmatpush1.bf16.msra.mxu1 %v3862_v11  ;;  %1699 = vmatprep.subr.bf16.mxu0 %v3867_v12  ;;  %v3945_v11 = vld [vmem:[#allocation5 + $0x1e4] ss:$16 sps:$4 sm:$0xff]   ;;  %v3943_v12 = vld [vmem:[#allocation5 + $0x1e0] ss:$16 sps:$4 sm:$0xff]  }
  0xe2   :  { %1724 = vmatprep.subr.bf16.mxu1 %v3870_v13  ;;  %v4021_v13 = vld [vmem:[#allocation5 + $0x240] ss:$16 sps:$4 sm:$0xff]  }
  0xe4   :  { %1700 = vmatpush2.bf16.msra.mxu0 %v3865_v14  ;;  %v4023_v14 = vld [vmem:[#allocation5 + $0x244] ss:$16 sps:$4 sm:$0xff]  }
  0xe5   :  { %1725 = vmatpush1.bf16.msra.mxu1 %v3868_v17  ;;  %1751 = vmatprep.subr.bf16.mxu0 %v3876_v19  ;;  %v3948_v17 = vld [vmem:[#allocation5 + $0x1c4] ss:$16 sps:$4 sm:$0xff]  }
  0xe6   :  { %1726 = vmatprep.subr.bf16.mxu1 %v3873_v18 }
  0xe7   :  { %1702 = vmatmul.mubr.bf16.vlgmr.msra.gmra.mxu0 %v4306_v7  ;;  %v3897_v7 = vld [vmem:[#allocation2 + $0x56c] ss:$16 sps:$4 sm:$0xff]  }
  0xe8   :  { %1752 = vmatpush1.bf16.msra.mxu0 %v3874_v21  ;;  %1783 = vmatprep.mubr.bf16.mxu0 %v4241_v16  ;;  %v3906_v16 = vld [vmem:[#allocation2 + $0x64c] ss:$16 sps:$4 sm:$0xff]  }
  0xe9   :  { %1727 = vmatpush2.bf16.msra.mxu1 %v3871_v20  ;;  %1753 = vmatprep.subr.bf16.mxu0 %v3882_v23  ;;  %v3946_v20 = vld [vmem:[#allocation5 + $0x1c0] ss:$16 sps:$4 sm:$0xff]   ;;  %v3951_v23 = vld [vmem:[#allocation5 + $0x1a4] ss:$16 sps:$4 sm:$0xff]  }
  0xea   :  { %1728 = vmatprep.subr.bf16.mxu1 %v3879_v22 }
  0xec   :  { %1754 = vmatpush1.bf16.msra.mxu0 %v3880_v25  ;;  %v4027_v25 = vld [vmem:[#allocation5 + $0x220] ss:$16 sps:$4 sm:$0xff]  }
  0xed   :  { %1729 = vmatpush2.bf16.msra.mxu1 %v3877_v24  ;;  %1755 = vmatprep.subr.bf16.mxu0 %v3888_v27  ;;  %v4029_v24 = vld [vmem:[#allocation5 + $0x224] ss:$16 sps:$4 sm:$0xff]  }
  0xee   :  { %1730 = vmatprep.subr.bf16.mxu1 %v3885_v26 }
  0xf0   :  { %1756 = vmatpush1.bf16.msra.mxu0 %v3886_v29 }
  0xf1   :  { %1731 = vmatpush2.bf16.msra.mxu1 %v3883_v28  ;;  %1757 = vmatprep.subr.bf16.mxu0 %v3894_v31  ;;  %v3949_v28 = vld [vmem:[#allocation5 + $0x1a0] ss:$16 sps:$4 sm:$0xff]   ;;  %v3954_v31 = vld [vmem:[#allocation5 + $0x184] ss:$16 sps:$4 sm:$0xff]  }
  0xf2   :  { %1732 = vmatprep.subr.bf16.mxu1 %v3891_v30 }
  0xf4   :  { %1758 = vmatpush1.bf16.msra.mxu0 %v3892_v33  ;;  %v4035_v33 = vld [vmem:[#allocation5 + $0x204] ss:$16 sps:$4 sm:$0xff]  }
  0xf5   :  { %1733 = vmatpush2.bf16.msra.mxu1 %v3889_v32  ;;  %1759 = vmatprep.subr.bf16.mxu0 %v3900_v51  ;;  %v4033_v32 = vld [vmem:[#allocation5 + $0x200] ss:$16 sps:$4 sm:$0xff]  }
  0xf6   :  { %1734 = vmatprep.subr.bf16.mxu1 %v3897_v7  ;;  %v3952_v7 = vld [vmem:[#allocation5 + $0x180] ss:$16 sps:$4 sm:$0xff]  }
  0xf7   :  { %v4039_v51 = vld [vmem:[#allocation5 + $0x3e0] ss:$16 sps:$4 sm:$0xff]  }
  0xf8   :  { %1760 = vmatpush1.bf16.msra.mxu0 %v3898_v36  ;;  %v3957_v36 = vld [vmem:[#allocation5 + $0x164] ss:$16 sps:$4 sm:$0xff]  }
  0xf9   :  { %1735 = vmatpush2.bf16.msra.mxu1 %v3895_v34  ;;  %1761 = vmatprep.subr.bf16.mxu0 %v3906_v16  ;;  %v4041_v34 = vld [vmem:[#allocation5 + $0x3e4] ss:$16 sps:$4 sm:$0xff]   ;;  %v3955_v16 = vld [vmem:[#allocation5 + $0x160] ss:$16 sps:$4 sm:$0xff]  }
  0xfa   :  { %1736 = vmatprep.subr.bf16.mxu1 %v3903_v37  ;;  %v4044_v37 = vld [vmem:[#allocation5 + $0x3c4] ss:$16 sps:$4 sm:$0xff]  }
  0xfc   :  { %1762 = vmatpush1.bf16.msra.mxu0 %v3904_v39  ;;  %v3960_v39 = vld [vmem:[#allocation5 + $0x144] ss:$16 sps:$4 sm:$0xff]  }
  0xfd   :  { %1737 = vmatpush2.bf16.msra.mxu1 %v3901_v38  ;;  %1763 = vmatprep.subr.bf16.mxu0 %v3912_v41  ;;  %v4042_v38 = vld [vmem:[#allocation5 + $0x3c0] ss:$16 sps:$4 sm:$0xff]  }
  0xfe   :  { %1738 = vmatprep.subr.bf16.mxu1 %v3909_v40  ;;  %v4047_v40 = vld [vmem:[#allocation5 + $0x3a4] ss:$16 sps:$4 sm:$0xff]   ;;  %v3958_v41 = vld [vmem:[#allocation5 + $0x140] ss:$16 sps:$4 sm:$0xff]  }
 0x100   :  { %1764 = vmatpush1.bf16.msra.mxu0 %v3910_v43  ;;  %v3963_v43 = vld [vmem:[#allocation5 + $0x124] ss:$16 sps:$4 sm:$0xff]  }
 0x101   :  { %1739 = vmatpush2.bf16.msra.mxu1 %v3907_v42  ;;  %1765 = vmatprep.subr.bf16.mxu0 %v3918_v45  ;;  %v4045_v42 = vld [vmem:[#allocation5 + $0x3a0] ss:$16 sps:$4 sm:$0xff]  }
 0x102   :  { %1740 = vmatprep.subr.bf16.mxu1 %v3915_v44  ;;  %v4050_v44 = vld [vmem:[#allocation5 + $0x384] ss:$16 sps:$4 sm:$0xff]   ;;  %v3961_v45 = vld [vmem:[#allocation5 + $0x120] ss:$16 sps:$4 sm:$0xff]  }
 0x104   :  { %1766 = vmatpush1.bf16.msra.mxu0 %v3916_v48  ;;  %v3966_v48 = vld [vmem:[#allocation5 + $0x104] ss:$16 sps:$4 sm:$0xff]  }
 0x105   :  { %1741 = vmatpush2.bf16.msra.mxu1 %v3913_v46  ;;  %2590 = vmatprep.subr.bf16.mxu0 %v3921_v49  ;;  %v4048_v46 = vld [vmem:[#allocation5 + $0x380] ss:$16 sps:$4 sm:$0xff]   ;;  %v4053_v49 = vld [vmem:[#allocation5 + $0x364] ss:$16 sps:$4 sm:$0xff]  }
 0x106   :  { %2631 = vmatprep.subr.bf16.mxu1 %v3993_v60 }
 0x107   :  { %1784 = vmatmul.mubr.bf16.vlgmr.msra.gmra.mxu0 %v4147_v53  ;;  %v3969_v53 = vld [vmem:[#allocation5 + $0xec] ss:$16 sps:$4 sm:$0xff]  }
 0x108   :  { %1743 = vmatmul.mubr.bf16.vlgmr.msra.gmra.mxu1 %v4327_v15  ;;  %2591 = vmatpush1.bf16.msra.mxu0 %v3919_v50  ;;  %v3931_v15 = vld [vmem:[#allocation5 + $0x60] ss:$16 sps:$4 sm:$0xff]  }
 0x109   :  { %2592 = vmatprep.subr.bf16.mxu0 %v3924_v52  ;;  %2632 = vmatpush1.bf16.msra.mxu1 %v3991_v59  ;;  %v3964_v50 = vld [vmem:[#allocation5 + $0x100] ss:$16 sps:$4 sm:$0xff]  }
 0x10a   :  { %2633 = vmatprep.subr.bf16.mxu1 %v3999_v47  ;;  %v4051_v52 = vld [vmem:[#allocation5 + $0x360] ss:$16 sps:$4 sm:$0xff]   ;;  %v4065_v47 = vld [vmem:[#allocation5 + $0x2ec] ss:$16 sps:$4 sm:$0xff]  }
 0x10b   :  { %v4057_v59 = vld [vmem:[#allocation5 + $0x320] ss:$16 sps:$4 sm:$0xff]  }
 0x10c   :  { %2593 = vmatpush1.bf16.msra.mxu0 %v3922_v54  ;;  %v4056_v54 = vld [vmem:[#allocation5 + $0x344] ss:$16 sps:$4 sm:$0xff]  }
 0x10d   :  { %2594 = vmatprep.subr.bf16.mxu0 %v3927_v55  ;;  %2634 = vmatpush1.bf16.msra.mxu1 %v3997_v62  ;;  %v4054_v55 = vld [vmem:[#allocation5 + $0x340] ss:$16 sps:$4 sm:$0xff]  }
 0x10e   :  { %2635 = vmatprep.subr.bf16.mxu1 %v4005_v1  ;;  %v4060_v62 = vld [vmem:[#allocation5 + $0x300] ss:$16 sps:$4 sm:$0xff]  }
 0x10f   :  { %v4353_v1 = vld [vmem:[%s4401_s2] sm:$0xf] }
 0x110   :  { %2595 = vmatpush1.bf16.msra.mxu0 %v3925_v56 }
 0x111   :  { %2596 = vmatprep.subr.bf16.mxu0 %v3930_v57  ;;  %2636 = vmatpush1.bf16.msra.mxu1 %v4003_v0 }
 0x112   :  { %2637 = vmatprep.subr.bf16.mxu1 %v4011_v35 }
 0x114   :  { %2597 = vmatpush1.bf16.msra.mxu0 %v3928_v58  ;;  %v4059_v58 = vld [vmem:[#allocation5 + $0x324] ss:$16 sps:$4 sm:$0xff]  }
 0x115   :  { %2598 = vmatprep.subr.bf16.mxu0 %v3933_v61  ;;  %2638 = vmatpush1.bf16.msra.mxu1 %v4009_v4 }
 0x116   :  { %2639 = vmatprep.subr.bf16.mxu1 %v4017_v10 }
 0x118   :  { %2599 = vmatpush1.bf16.msra.mxu0 %v3931_v15  ;;  %v4062_v15 = vld [vmem:[#allocation5 + $0x304] ss:$16 sps:$4 sm:$0xff]  }
 0x119   :  { %2600 = vmatprep.subr.bf16.mxu0 %v3936_v6  ;;  %2640 = vmatpush1.bf16.msra.mxu1 %v4015_v9  ;;  %v299_v6 = vlaneseq }
 0x11a   :  { %2641 = vmatprep.subr.bf16.mxu1 %v4023_v14 }
 0x11c   :  { %2601 = vmatpush1.bf16.msra.mxu0 %v3934_v63  ;;  %v4347_v63 = vshrl.u32 %v299_v6, 7 }
 0x11d   :  { %2602 = vmatprep.subr.bf16.mxu0 %v3939_v2  ;;  %2642 = vmatpush1.bf16.msra.mxu1 %v4021_v13 }
 0x11e   :  { %2643 = vmatprep.subr.bf16.mxu1 %v4029_v24  ;;  %v301_v0 = vsub.s32 0, %v4347_v63  ;;  %v305_v2 = vsub.s32 1, %v4347_v63 }
 0x120   :  { %2603 = vmatpush1.bf16.msra.mxu0 %v3937_v3  ;;  %v302_v3 = vrot.slane %v4353_v1, %v301_v0  ;;  %v306_v4 = vrot.slane %v4353_v1, %v305_v2 }
 0x121   :  { %2604 = vmatprep.subr.bf16.mxu0 %v3942_v5  ;;  %2644 = vmatpush1.bf16.msra.mxu1 %v4027_v25 }
 0x122   :  { %2645 = vmatprep.subr.bf16.mxu1 %v4035_v33  ;;  %v3984_v33 = vld [vmem:[#allocation5 + $0x4c] ss:$16 sps:$4 sm:$0xff]  }
 0x124   :  { %2605 = vmatpush1.bf16.msra.mxu0 %v3940_v8 }
 0x125   :  { %2606 = vmatprep.subr.bf16.mxu0 %v3945_v11  ;;  %2646 = vmatpush1.bf16.msra.mxu1 %v4033_v32  ;;  %v3979_v32 = vld [vmem:[#allocation5 + $0x68] ss:$16 sps:$4 sm:$0xff]  }
 0x126   :  { %2647 = vmatprep.subr.bf16.mxu1 %v4041_v34 }
 0x127   :  { %v4339_v18 = vpop.f32.mrf.mxu0 }
 0x128   :  { %v4341_v19 = vpop.f32.mrf.mxu1  ;;  %2607 = vmatpush2.bf16.msra.mxu0 %v3943_v12  ;;  %v1499_v35 = vadd.f32 %v4339_v18, %v302_v3  ;;  %v3972_v18 = vld [vmem:[#allocation5 + $0xcc] ss:$16 sps:$4 sm:$0xff]  }
 0x129   :  { %v4343_v21 = vpop.f32.mrf.mxu0  ;;  %2608 = vmatprep.subr.bf16.mxu0 %v3948_v17  ;;  %2648 = vmatpush2.bf16.msra.mxu1 %v4039_v51  ;;  %v3987_v51 = vld [vmem:[#allocation5 + $0x2c] ss:$16 sps:$4 sm:$0xff]  }
 0x12a   :  { %v4345_v22 = vpop.f32.mrf.mxu1  ;;  %2649 = vmatprep.subr.bf16.mxu1 %v4044_v37  ;;  %v1501_v5 = vadd.f32 %v4343_v21, %v306_v4  ;;  %v1540_v8 = vadd.f32 %v4341_v19, %v1499_v35  ;;  %v3970_v19 = vld [vmem:[#allocation5 + $0xc8] ss:$16 sps:$4 sm:$0xff]   ;;  %v3975_v21 = vld [vmem:[#allocation5 + $0xac] ss:$16 sps:$4 sm:$0xff]  }
 0x12b   :  { %v1502_v26 = vpop.f32.mrf.mxu0 }
 0x12c   :  { %v1543_v27 = vpop.f32.mrf.mxu1  ;;  %2609 = vmatpush2.bf16.msra.mxu0 %v3946_v20  ;;  %v1542_v10 = vadd.f32 %v4345_v22, %v1501_v5  ;;  %v3973_v22 = vld [vmem:[#allocation5 + $0xa8] ss:$16 sps:$4 sm:$0xff]  }
 0x12d   :  { %v1503_v29 = vpop.f32.mrf.mxu0  ;;  %2610 = vmatprep.subr.bf16.mxu0 %v3951_v23  ;;  %2650 = vmatpush2.bf16.msra.mxu1 %v4042_v38  ;;  %v3967_v27 = vld [vmem:[#allocation5 + $0xe8] ss:$16 sps:$4 sm:$0xff]  }
 0x12e   :  { %v1544_v30 = vpop.f32.mrf.mxu1  ;;  %2651 = vmatprep.subr.bf16.mxu1 %v4047_v40  ;;  %v3978_v29 = vld [vmem:[#allocation5 + $0x8c] ss:$16 sps:$4 sm:$0xff]  }
 0x12f   :  { %v3976_v30 = vld [vmem:[#allocation5 + $0x88] ss:$16 sps:$4 sm:$0xff]  }
 0x130   :  { %2611 = vmatpush2.bf16.msra.mxu0 %v3949_v28 }
 0x131   :  { %2612 = vmatprep.subr.bf16.mxu0 %v3954_v31  ;;  %2652 = vmatpush2.bf16.msra.mxu1 %v4045_v42  ;;  %v3981_v31 = vld [vmem:[#allocation5 + $0x6c] ss:$16 sps:$4 sm:$0xff]   ;;  %v3994_v42 = vld [vmem:[#allocation5 + $0x1e8] ss:$16 sps:$4 sm:$0xff]  }
 0x132   :  { %2653 = vmatprep.subr.bf16.mxu1 %v4050_v44  ;;  %v4000_v44 = vld [vmem:[#allocation5 + $0x1c8] ss:$16 sps:$4 sm:$0xff]  }
 0x134   :  { %2613 = vmatpush2.bf16.msra.mxu0 %v3952_v7  ;;  %v3982_v7 = vld [vmem:[#allocation5 + $0x48] ss:$16 sps:$4 sm:$0xff]  }
 0x135   :  { %2614 = vmatprep.subr.bf16.mxu0 %v3957_v36  ;;  %2654 = vmatpush2.bf16.msra.mxu1 %v4048_v46  ;;  %v3985_v36 = vld [vmem:[#allocation5 + $0x28] ss:$16 sps:$4 sm:$0xff]  }
 0x136   :  { %2655 = vmatprep.subr.bf16.mxu1 %v4053_v49  ;;  %v4006_v46 = vld [vmem:[#allocation5 + $0x1a8] ss:$16 sps:$4 sm:$0xff]  }
 0x137   :  { %v4012_v49 = vld [vmem:[#allocation5 + $0x188] ss:$16 sps:$4 sm:$0xff]  }
 0x138   :  { %2615 = vmatpush2.bf16.msra.mxu0 %v3955_v16  ;;  %v3990_v16 = vld [vmem:[#allocation5 + $0xc] ss:$16 sps:$4 sm:$0xff]  }
 0x139   :  { %2616 = vmatprep.subr.bf16.mxu0 %v3960_v39  ;;  %2656 = vmatpush2.bf16.msra.mxu1 %v4051_v52  ;;  %v3988_v39 = vld [vmem:[#allocation5 + $0x8] ss:$16 sps:$4 sm:$0xff]  }
 0x13a   :  { %2657 = vmatprep.subr.bf16.mxu1 %v4056_v54  ;;  %v4018_v52 = vld [vmem:[#allocation5 + $0x168] ss:$16 sps:$4 sm:$0xff]  }
 0x13b   :  { %v4024_v54 = vld [vmem:[#allocation5 + $0x148] ss:$16 sps:$4 sm:$0xff]  }
 0x13c   :  { %2617 = vmatpush2.bf16.msra.mxu0 %v3958_v41  ;;  %v3996_v41 = vld [vmem:[#allocation5 + $0x1ec] ss:$16 sps:$4 sm:$0xff]  }
 0x13d   :  { %2618 = vmatprep.subr.bf16.mxu0 %v3963_v43  ;;  %2658 = vmatpush2.bf16.msra.mxu1 %v4054_v55  ;;  %v4002_v43 = vld [vmem:[#allocation5 + $0x1cc] ss:$16 sps:$4 sm:$0xff]  }
 0x13e   :  { %2659 = vmatprep.subr.bf16.mxu1 %v4059_v58  ;;  %v4032_v55 = vld [vmem:[#allocation5 + $0x12c] ss:$16 sps:$4 sm:$0xff]  }
 0x140   :  { %2619 = vmatpush2.bf16.msra.mxu0 %v3961_v45  ;;  %v4008_v45 = vld [vmem:[#allocation5 + $0x1ac] ss:$16 sps:$4 sm:$0xff]  }
 0x141   :  { %2620 = vmatprep.subr.bf16.mxu0 %v3966_v48  ;;  %2660 = vmatpush2.bf16.msra.mxu1 %v4057_v59  ;;  %v4014_v48 = vld [vmem:[#allocation5 + $0x18c] ss:$16 sps:$4 sm:$0xff]  }
 0x142   :  { %2661 = vmatprep.subr.bf16.mxu1 %v4062_v15  ;;  %v4038_v59 = vld [vmem:[#allocation5 + $0x10c] ss:$16 sps:$4 sm:$0xff]  }
 0x144   :  { %2621 = vmatpush2.bf16.msra.mxu0 %v3964_v50  ;;  %v4020_v50 = vld [vmem:[#allocation5 + $0x16c] ss:$16 sps:$4 sm:$0xff]  }
 0x145   :  { %2672 = vmatprep.subr.bf16.mxu0 %v3969_v53  ;;  %2662 = vmatpush2.bf16.msra.mxu1 %v4060_v62  ;;  %v4026_v53 = vld [vmem:[#allocation5 + $0x14c] ss:$16 sps:$4 sm:$0xff]   ;;  %v309_v62 = vsub.s32 2, %v4347_v63 }
 0x146   :  { %2713 = vmatprep.subr.bf16.mxu1 %v4065_v47  ;;  %v313_v47 = vsub.s32 3, %v4347_v63 }
 0x147   :  { %v310_v6 = vrot.slane %v4353_v1, %v309_v62 }
 0x148   :  { %v1621_v56 = vpop.f32.mrf.mxu1  ;;  %v314_v3 = vrot.slane %v4353_v1, %v313_v47  ;;  %v4063_v1 = vld [vmem:[#allocation5 + $0x2e8] ss:$16 sps:$4 sm:$0xff]  }
 0x14a   :  { %v1623_v57 = vpop.f32.mrf.mxu1 }
 0x14c   :  { %v1625_v60 = vpop.f32.mrf.mxu1 }
 0x14e   :  { %v1626_v61 = vpop.f32.mrf.mxu1 }
 0x14f   :  { %v4036_v61 = vld [vmem:[#allocation5 + $0x108] ss:$16 sps:$4 sm:$0xff]  }
 0x167   :  { %v1580_v9 = vpop.f32.mrf.mxu0 }
 0x168   :  { %v1581_v11 = vadd.f32 %v1580_v9, %v1540_v8 }
 0x169   :  { %v1582_v12 = vpop.f32.mrf.mxu0 }
 0x16a   :  { %v1622_v13 = vadd.f32 %v1621_v56, %v1581_v11  ;;  %v1583_v14 = vadd.f32 %v1582_v12, %v1542_v10 }
 0x16b   :  { %v1584_v17 = vpop.f32.mrf.mxu0 }
 0x16c   :  { %v1624_v20 = vadd.f32 %v1623_v57, %v1583_v14  ;;  %v1792_v23 = vmax.f32 %v1622_v13, 0.0  ;;  %v4030_v57 = vld [vmem:[#allocation5 + $0x128] ss:$16 sps:$4 sm:$0xff]  }
 0x16d   :  { %v1585_v24 = vpop.f32.mrf.mxu0 }
 0x16e   :  { %v1793_v25 = vmax.f32 %v1624_v20, 0.0  ;;  %v4366_v28 = vpack.c.bf16 %v1792_v23, %v1792_v23 }
 0x170   :  { %v1797_v26 = vpack.c.bf16 %v1793_v25, %v1793_v25 }
 0x172   :  { %2622 = vmatprep.mubr.bf16.mxu0 %v1797_v26 }
 0x173   :  { %2623 = vmatmul.mubr.bf16.vlgmr.msra.gmra.mxu0 %v4366_v28 }
 0x174   :  { %2673 = vmatpush1.bf16.msra.mxu0 %v3967_v27  ;;  %2704 = vmatprep.mubr.bf16.mxu0 %v1797_v26 }
 0x175   :  { %2674 = vmatprep.subr.bf16.mxu0 %v3972_v18 }
 0x178   :  { %2675 = vmatpush1.bf16.msra.mxu0 %v3970_v19 }
 0x179   :  { %2676 = vmatprep.subr.bf16.mxu0 %v3975_v21  ;;  %v4068_v21 = vld [vmem:[#allocation5 + $0x2cc] ss:$16 sps:$4 sm:$0xff]  }
 0x17c   :  { %2677 = vmatpush1.bf16.msra.mxu0 %v3973_v22  ;;  %v4066_v22 = vld [vmem:[#allocation5 + $0x2c8] ss:$16 sps:$4 sm:$0xff]  }
 0x17d   :  { %2678 = vmatprep.subr.bf16.mxu0 %v3978_v29  ;;  %v4071_v29 = vld [vmem:[#allocation5 + $0x2ac] ss:$16 sps:$4 sm:$0xff]  }
 0x180   :  { %2679 = vmatpush1.bf16.msra.mxu0 %v3976_v30  ;;  %v4069_v30 = vld [vmem:[#allocation5 + $0x2a8] ss:$16 sps:$4 sm:$0xff]  }
 0x181   :  { %2680 = vmatprep.subr.bf16.mxu0 %v3981_v31  ;;  %v4074_v31 = vld [vmem:[#allocation5 + $0x28c] ss:$16 sps:$4 sm:$0xff]  }
 0x184   :  { %2681 = vmatpush1.bf16.msra.mxu0 %v3979_v32  ;;  %v4072_v32 = vld [vmem:[#allocation5 + $0x288] ss:$16 sps:$4 sm:$0xff]  }
 0x185   :  { %2682 = vmatprep.subr.bf16.mxu0 %v3984_v33  ;;  %v4077_v33 = vld [vmem:[#allocation5 + $0x26c] ss:$16 sps:$4 sm:$0xff]  }
 0x188   :  { %v1662_v34 = vpop.f32.mrf.mxu1  ;;  %2683 = vmatpush1.bf16.msra.mxu0 %v3982_v7  ;;  %v4075_v7 = vld [vmem:[#allocation5 + $0x268] ss:$16 sps:$4 sm:$0xff]  }
 0x189   :  { %2684 = vmatprep.subr.bf16.mxu0 %v3987_v51  ;;  %v1663_v4 = vadd.f32 %v1662_v34, %v310_v6  ;;  %v4080_v51 = vld [vmem:[#allocation5 + $0x24c] ss:$16 sps:$4 sm:$0xff]   ;;  %v4078_v34 = vld [vmem:[#allocation5 + $0x248] ss:$16 sps:$4 sm:$0xff]  }
 0x18a   :  { %v1664_v37 = vpop.f32.mrf.mxu1  ;;  %v4105_v6 = vld [vmem:[#allocation5 + $0x328] ss:$16 sps:$4 sm:$0xff]  }
 0x18b   :  { %v1665_v35 = vadd.f32 %v1664_v37, %v314_v3  ;;  %v4081_v37 = vld [vmem:[#allocation5 + $0x228] ss:$16 sps:$4 sm:$0xff]  }
 0x18c   :  { %v1666_v38 = vpop.f32.mrf.mxu1  ;;  %2685 = vmatpush1.bf16.msra.mxu0 %v3985_v36  ;;  %v4083_v36 = vld [vmem:[#allocation5 + $0x22c] ss:$16 sps:$4 sm:$0xff]  }
 0x18d   :  { %2686 = vmatprep.subr.bf16.mxu0 %v3990_v16  ;;  %v4086_v16 = vld [vmem:[#allocation5 + $0x20c] ss:$16 sps:$4 sm:$0xff]   ;;  %v4084_v38 = vld [vmem:[#allocation5 + $0x208] ss:$16 sps:$4 sm:$0xff]  }
 0x18e   :  { %v1667_v40 = vpop.f32.mrf.mxu1  ;;  %v4120_v3 = vld [vmem:[#allocation7 + $0x18] sm:$0xff]  }
 0x18f   :  { %v4087_v40 = vld [vmem:[#allocation5 + $0x3e8] ss:$16 sps:$4 sm:$0xff]  }
 0x190   :  { %2687 = vmatpush1.bf16.msra.mxu0 %v3988_v39  ;;  %v4089_v39 = vld [vmem:[#allocation5 + $0x3ec] ss:$16 sps:$4 sm:$0xff]  }
 0x191   :  { %2688 = vmatprep.subr.bf16.mxu0 %v3996_v41  ;;  %v4092_v41 = vld [vmem:[#allocation5 + $0x3cc] ss:$16 sps:$4 sm:$0xff]  }
 0x194   :  { %2689 = vmatpush2.bf16.msra.mxu0 %v3994_v42  ;;  %v4090_v42 = vld [vmem:[#allocation5 + $0x3c8] ss:$16 sps:$4 sm:$0xff]  }
 0x195   :  { %2690 = vmatprep.subr.bf16.mxu0 %v4002_v43  ;;  %v4095_v43 = vld [vmem:[#allocation5 + $0x3ac] ss:$16 sps:$4 sm:$0xff]  }
 0x198   :  { %2691 = vmatpush2.bf16.msra.mxu0 %v4000_v44  ;;  %v4093_v44 = vld [vmem:[#allocation5 + $0x3a8] ss:$16 sps:$4 sm:$0xff]  }
 0x199   :  { %2692 = vmatprep.subr.bf16.mxu0 %v4008_v45  ;;  %v4098_v45 = vld [vmem:[#allocation5 + $0x38c] ss:$16 sps:$4 sm:$0xff]  }
 0x19c   :  { %2693 = vmatpush2.bf16.msra.mxu0 %v4006_v46  ;;  %v4111_v46 = vld [vmem:[#allocation7 + $0x78] sm:$0xff]  }
 0x19d   :  { %2694 = vmatprep.subr.bf16.mxu0 %v4014_v48  ;;  %v4112_v48 = vld [vmem:[#allocation7 + $0x38] sm:$0xff]  }
 0x1a0   :  { %2695 = vmatpush2.bf16.msra.mxu0 %v4012_v49  ;;  %v4113_v49 = vld [vmem:[#allocation7 + $0x70] sm:$0xff]  }
 0x1a1   :  { %2696 = vmatprep.subr.bf16.mxu0 %v4020_v50  ;;  %v4096_v50 = vld [vmem:[#allocation5 + $0x388] ss:$16 sps:$4 sm:$0xff]  }
 0x1a4   :  { %2697 = vmatpush2.bf16.msra.mxu0 %v4018_v52  ;;  %v4114_v52 = vld [vmem:[#allocation7 + $0x30] sm:$0xff]  }
 0x1a5   :  { %2698 = vmatprep.subr.bf16.mxu0 %v4026_v53  ;;  %v4101_v53 = vld [vmem:[#allocation5 + $0x36c] ss:$16 sps:$4 sm:$0xff]  }
 0x1a7   :  { %v1703_v56 = vpop.f32.mrf.mxu0 }
 0x1a8   :  { %2699 = vmatpush2.bf16.msra.mxu0 %v4024_v54  ;;  %v1704_v5 = vadd.f32 %v1703_v56, %v1663_v4  ;;  %v4115_v54 = vld [vmem:[#allocation7 + $0x68] sm:$0xff]  }
 0x1a9   :  { %v1705_v58 = vpop.f32.mrf.mxu0  ;;  %2700 = vmatprep.subr.bf16.mxu0 %v4032_v55  ;;  %v4099_v55 = vld [vmem:[#allocation5 + $0x368] ss:$16 sps:$4 sm:$0xff]   ;;  %v4110_v4 = vld [vmem:[#allocation5 + $0x30c] ss:$16 sps:$4 sm:$0xff]  }
 0x1aa   :  { %v1706_v10 = vadd.f32 %v1705_v58, %v1665_v35  ;;  %v4116_v56 = vld [vmem:[#allocation7 + $0x28] sm:$0xff]   ;;  %v4117_v58 = vld [vmem:[#allocation7 + $0x60] sm:$0xff]   ;;  %v4121_v35 = vld [vmem:[#allocation7 + $0x50] sm:$0xff]  }
 0x1ab   :  { %v1707_v60 = vpop.f32.mrf.mxu0 }
 0x1ac   :  { %2701 = vmatpush2.bf16.msra.mxu0 %v4030_v57  ;;  %v4104_v57 = vld [vmem:[#allocation5 + $0x34c] ss:$16 sps:$4 sm:$0xff]   ;;  %v4118_v60 = vld [vmem:[#allocation7 + $0x20] sm:$0xff]  }
 0x1ad   :  { %v1708_v15 = vpop.f32.mrf.mxu0  ;;  %2702 = vmatprep.subr.bf16.mxu0 %v4038_v59  ;;  %v4102_v59 = vld [vmem:[#allocation5 + $0x348] ss:$16 sps:$4 sm:$0xff]  }
 0x1ae   :  { %v4119_v15 = vld [vmem:[#allocation7 + $0x58] sm:$0xff]  }
 0x1b0   :  { %2703 = vmatpush2.bf16.msra.mxu0 %v4036_v61  ;;  %v4107_v61 = vld [vmem:[#allocation5 + $0x32c] ss:$16 sps:$4 sm:$0xff]  }
 0x1b1   :  { %3523 = vmatprep.subr.bf16.mxu0 %v4111_v46 }
 0x1b3   :  { %2705 = vmatmul.mubr.bf16.vlgmr.msra.gmra.mxu0 %v4366_v28 }
 0x1b4   :  { %3524 = vmatpush3.bf16.msra.mxu0 %v4112_v48 }
 0x1b5   :  { %3525 = vmatprep.subr.bf16.mxu0 %v4113_v49 }
 0x1b8   :  { %3526 = vmatpush3.bf16.msra.mxu0 %v4114_v52 }
 0x1b9   :  { %3527 = vmatprep.subr.bf16.mxu0 %v4115_v54 }
 0x1bc   :  { %3528 = vmatpush3.bf16.msra.mxu0 %v4116_v56 }
 0x1bd   :  { %3529 = vmatprep.subr.bf16.mxu0 %v4117_v58 }
 0x1c0   :  { %3530 = vmatpush3.bf16.msra.mxu0 %v4118_v60 }
 0x1c1   :  { %3531 = vmatprep.subr.bf16.mxu0 %v4119_v15 }
 0x1c4   :  { %3532 = vmatpush3.bf16.msra.mxu0 %v4120_v3 }
 0x1c5   :  { %3533 = vmatprep.subr.bf16.mxu0 %v4121_v35 }
 0x1c7   :  { %v1785_v9 = vpop.f32.mrf.mxu0 }
 0x1c8   :  { %v1744_v8 = vpop.f32.mrf.mxu1 }
 0x1c9   :  { %v1745_v11 = vadd.f32 %v1744_v8, %v1704_v5  ;;  %v1787_v13 = vpop.f32.mrf.mxu0  ;;  %v4108_v5 = vld [vmem:[#allocation5 + $0x308] ss:$16 sps:$4 sm:$0xff]   ;;  %v4122_v8 = vld [vmem:[#allocation7 + $0x10] sm:$0xff]  }
 0x1ca   :  { %v1746_v12 = vpop.f32.mrf.mxu1  ;;  %3534 = vmatpush3.bf16.msra.mxu0 %v4122_v8 }
 0x1cb   :  { %v1786_v14 = vadd.f32 %v1785_v9, %v1745_v11  ;;  %v1747_v17 = vadd.f32 %v1746_v12, %v1706_v10  ;;  %v1789_v23 = vpop.f32.mrf.mxu0  ;;  %v4123_v9 = vld [vmem:[#allocation7 + $0x48] sm:$0xff]   ;;  %v4125_v11 = vld [vmem:[#allocation7 + $0x40] sm:$0xff]  }
 0x1cc   :  { %v1748_v20 = vpop.f32.mrf.mxu1  ;;  %v4124_v10 = vld [vmem:[#allocation7 + $0x8] sm:$0xff]   ;;  %3535 = vmatprep.subr.bf16.mxu0 %v4123_v9  ;;  %v4126_v12 = vld [vmem:[#allocation7] sm:$0xff]  }
 0x1cd   :  { %v1788_v24 = vadd.f32 %v1787_v13, %v1747_v17  ;;  %v1794_v25 = vmax.f32 %v1786_v14, 0.0  ;;  %v1790_v27 = vpop.f32.mrf.mxu0  ;;  %v4127_v13 = vld [vmem:[#allocation7 + $0xf8] sm:$0xff]   ;;  %v4129_v17 = vld [vmem:[#allocation7 + $0xf0] sm:$0xff]   ;;  %v4131_v23 = vld [vmem:[#allocation7 + $0xe8] sm:$0xff]  }
 0x1ce   :  { %v1749_v26 = vpop.f32.mrf.mxu1  ;;  %3536 = vmatpush3.bf16.msra.mxu0 %v4124_v10  ;;  %v4128_v14 = vld [vmem:[#allocation7 + $0xb8] sm:$0xff]   ;;  %v4130_v20 = vld [vmem:[#allocation7 + $0xb0] sm:$0xff]  }
 0x1cf   :  { %v1795_v28 = vmax.f32 %v1788_v24, 0.0  ;;  %v4378_v19 = vpack.c.bf16 %v1794_v25, %v1794_v25  ;;  %3537 = vmatprep.subr.bf16.mxu0 %v4125_v11  ;;  %v4132_v24 = vld [vmem:[#allocation7 + $0xa8] sm:$0xff]   ;;  %v4133_v25 = vld [vmem:[#allocation7 + $0xe0] sm:$0xff]   ;;  %v4135_v27 = vld [vmem:[#allocation7 + $0xd8] sm:$0xff]  }
 0x1d0   :  { %v4134_v26 = vld [vmem:[#allocation7 + $0xa0] sm:$0xff]  }
 0x1d1   :  { %v1799_v18 = vpack.c.bf16 %v1795_v28, %v1795_v28  ;;  %v4136_v28 = vld [vmem:[#allocation7 + $0x98] sm:$0xff]  }
 0x1d2   :  { %3538 = vmatpush3.bf16.msra.mxu0 %v4126_v12 }
 0x1d3   :  { %2663 = vmatprep.mubr.bf16.mxu1 %v1799_v18 }
 0x1d4   :  { %2664 = vmatmul.mubr.bf16.vlgmr.msra.gmra.mxu1 %v4378_v19 }
 0x1d5   :  { %2714 = vmatpush1.bf16.msra.mxu1 %v4063_v1  ;;  %2745 = vmatprep.mubr.bf16.mxu1 %v1799_v18  ;;  %v4137_v18 = vld [vmem:[#allocation7 + $0xd0] sm:$0xff]  }
 0x1d6   :  { %2715 = vmatprep.subr.bf16.mxu1 %v4068_v21  ;;  %v4138_v1 = vld [vmem:[#allocation7 + $0x90] sm:$0xff]  }
 0x1d9   :  { %2716 = vmatpush1.bf16.msra.mxu1 %v4066_v22 }
 0x1da   :  { %2717 = vmatprep.subr.bf16.mxu1 %v4071_v29 }
 0x1dd   :  { %2718 = vmatpush1.bf16.msra.mxu1 %v4069_v30  ;;  %v4139_v30 = vld [vmem:[#allocation7 + $0xc8] sm:$0xff]  }
 0x1de   :  { %2719 = vmatprep.subr.bf16.mxu1 %v4074_v31  ;;  %v4140_v31 = vld [vmem:[#allocation7 + $0x88] sm:$0xff]  }
 0x1e1   :  { %2720 = vmatpush1.bf16.msra.mxu1 %v4072_v32  ;;  %v4141_v32 = vld [vmem:[#allocation7 + $0xc0] sm:$0xff]  }
 0x1e2   :  { %2721 = vmatprep.subr.bf16.mxu1 %v4077_v33  ;;  %v4142_v33 = vld [vmem:[#allocation7 + $0x80] sm:$0xff]  }
 0x1e5   :  { %2722 = vmatpush1.bf16.msra.mxu1 %v4075_v7 }
 0x1e6   :  { %2723 = vmatprep.subr.bf16.mxu1 %v4080_v51 }
 0x1e9   :  { %2724 = vmatpush1.bf16.msra.mxu1 %v4078_v34 }
 0x1ea   :  { %2725 = vmatprep.subr.bf16.mxu1 %v4083_v36 }
 0x1ed   :  { %2726 = vmatpush1.bf16.msra.mxu1 %v4081_v37  ;;  %v1928_v37 = vld [vmem:[%s4403_s4] sm:$0xf] }
 0x1ee   :  { %2727 = vmatprep.subr.bf16.mxu1 %v4086_v16  ;;  %v1933_v16 = vrot.slane %v1928_v37, %v301_v0  ;;  %v1941_v0 = vrot.slane %v1928_v37, %v309_v62 }
 0x1f1   :  { %2728 = vmatpush1.bf16.msra.mxu1 %v4084_v38  ;;  %v1937_v38 = vrot.slane %v1928_v37, %v305_v2  ;;  %v1945_v2 = vrot.slane %v1928_v37, %v313_v47  ;;  %v3490_v47 = vld [vmem:[%s4405_s6] ss:$0 sm:$0xff]  ;;  %s4208_s6 = scalar_lea.vmem %s3122_s8, 128 }
 0x1f2   :  { %2729 = vmatprep.subr.bf16.mxu1 %v4089_v39  ;;  %p4209_p1 = scmp.ne.s32.totalorder %s3122_s8, %s4208_s6  ;;  %p4214_p3 = scmp.lt.s32.totalorder %s4208_s6, %s4208_s6 }
 0x1f4   :  { %p4215_p4 = por %p4214_p3, %p4213_p2 }
 0x1f5   :  { %2730 = vmatpush2.bf16.msra.mxu1 %v4087_v40 }
 0x1f6   :  { %2731 = vmatprep.subr.bf16.mxu1 %v4092_v41  ;;  %p4216_p5 = pnand %p4215_p4, %p4209_p1 }
 0x1f9   :  { %2732 = vmatpush2.bf16.msra.mxu1 %v4090_v42 }
 0x1fa   :  { %2733 = vmatprep.subr.bf16.mxu1 %v4095_v43 }
 0x1fd   :  { %2734 = vmatpush2.bf16.msra.mxu1 %v4093_v44 }
 0x1fe   :  { %2735 = vmatprep.subr.bf16.mxu1 %v4098_v45 }
 0x201   :  { %2736 = vmatpush2.bf16.msra.mxu1 %v4096_v50 }
 0x202   :  { %2737 = vmatprep.subr.bf16.mxu1 %v4101_v53 }
 0x205   :  { %2738 = vmatpush2.bf16.msra.mxu1 %v4099_v55 }
 0x206   :  { %2739 = vmatprep.subr.bf16.mxu1 %v4104_v57 }
 0x209   :  { %2740 = vmatpush2.bf16.msra.mxu1 %v4102_v59 }
 0x20a   :  { %2741 = vmatprep.subr.bf16.mxu1 %v4107_v61 }
 0x20d   :  { %2742 = vmatpush2.bf16.msra.mxu1 %v4105_v6 }
 0x20e   :  { %2743 = vmatprep.subr.bf16.mxu1 %v4110_v4 }
 0x211   :  { %2744 = vmatpush2.bf16.msra.mxu1 %v4108_v5 }
 0x212   :  { %3545 = vmatprep.subr.bf16.mxu1 %v4127_v13 }
 0x214   :  { %2746 = vmatmul.mubr.bf16.vlgmr.msra.gmra.mxu1 %v4378_v19 }
 0x215   :  { %3546 = vmatpush3.bf16.msra.mxu1 %v4128_v14 }
 0x216   :  { %3547 = vmatprep.subr.bf16.mxu1 %v4129_v17 }
 0x219   :  { %3548 = vmatpush3.bf16.msra.mxu1 %v4130_v20 }
 0x21a   :  { %3549 = vmatprep.subr.bf16.mxu1 %v4131_v23 }
 0x21d   :  { %3550 = vmatpush3.bf16.msra.mxu1 %v4132_v24 }
 0x21e   :  { %3551 = vmatprep.subr.bf16.mxu1 %v4133_v25 }
 0x221   :  { %3552 = vmatpush3.bf16.msra.mxu1 %v4134_v26 }
 0x222   :  { %3553 = vmatprep.subr.bf16.mxu1 %v4135_v27 }
 0x225   :  { %3554 = vmatpush3.bf16.msra.mxu1 %v4136_v28 }
 0x226   :  { %3555 = vmatprep.subr.bf16.mxu1 %v4137_v18 }
 0x229   :  { %3556 = vmatpush3.bf16.msra.mxu1 %v4138_v1 }
 0x22a   :  { %3557 = vmatprep.subr.bf16.mxu1 %v4139_v30 }
 0x22d   :  { %3558 = vmatpush3.bf16.msra.mxu1 %v4140_v31 }
 0x22e   :  { %3559 = vmatprep.subr.bf16.mxu1 %v4141_v32 }
 0x231   :  { %3560 = vmatpush3.bf16.msra.mxu1 %v4142_v33 }
 0x233   :  { %v2624_v19 = vpop.f32.mrf.mxu0 }
 0x234   :  { %v2625_v39 = vadd.f32 %v2624_v19, %v1933_v16 }
 0x235   :  { %v2626_v21 = vpop.f32.mrf.mxu0 }
 0x236   :  { %v2627_v41 = vadd.f32 %v2626_v21, %v1937_v38 }
 0x237   :  { %v2628_v22 = vpop.f32.mrf.mxu0 }
 0x239   :  { %v2629_v29 = vpop.f32.mrf.mxu0 }
 0x273   :  { %v2706_v7 = vpop.f32.mrf.mxu0 }
 0x274   :  { %v2707_v53 = vadd.f32 %v2706_v7, %v1941_v0 }
 0x275   :  { %v2708_v51 = vpop.f32.mrf.mxu0 }
 0x276   :  { %v2709_v55 = vadd.f32 %v2708_v51, %v1945_v2 }
 0x277   :  { %v2710_v34 = vpop.f32.mrf.mxu0 }
 0x279   :  { %v2711_v36 = vpop.f32.mrf.mxu0 }
 0x294   :  { %v2665_v40 = vpop.f32.mrf.mxu1 }
 0x295   :  { %v2666_v42 = vadd.f32 %v2665_v40, %v2625_v39 }
 0x296   :  { %v2667_v43 = vpop.f32.mrf.mxu1 }
 0x297   :  { %v2668_v44 = vadd.f32 %v2667_v43, %v2627_v41  ;;  %v2754_v45 = vmax.f32 %v2666_v42, 0.0 }
 0x298   :  { %v2669_v46 = vpop.f32.mrf.mxu1 }
 0x299   :  { %v2755_v48 = vmax.f32 %v2668_v44, 0.0  ;;  %v2758_v52 = vpack.c.bf16 %v2754_v45, %v2754_v45 }
 0x29a   :  { %v2670_v49 = vpop.f32.mrf.mxu1 }
 0x29b   :  { %v2759_v50 = vpack.c.bf16 %v2755_v48, %v2755_v48 }
 0x29d   :  { %3057 = vmatprep.mubr.bf16.mxu0 %v2759_v50 }
 0x29e   :  { %3058 = vmatmul.mubr.bf16.vlgmr.msra.gmra.mxu0 %v2758_v52 }
 0x2d4   :  { %v2747_v54 = vpop.f32.mrf.mxu1 }
 0x2d5   :  { %v2748_v56 = vadd.f32 %v2747_v54, %v2707_v53 }
 0x2d6   :  { %v2749_v57 = vpop.f32.mrf.mxu1 }
 0x2d7   :  { %v2750_v58 = vadd.f32 %v2749_v57, %v2709_v55  ;;  %v2756_v59 = vmax.f32 %v2748_v56, 0.0 }
 0x2d8   :  { %v2751_v60 = vpop.f32.mrf.mxu1 }
 0x2d9   :  { %v2757_v61 = vmax.f32 %v2750_v58, 0.0  ;;  %v2760_v3 = vpack.c.bf16 %v2756_v59, %v2756_v59 }
 0x2da   :  { %v2752_v15 = vpop.f32.mrf.mxu1 }
 0x2db   :  { %v2761_v6 = vpack.c.bf16 %v2757_v61, %v2757_v61 }
 0x2dd   :  { %3097 = vmatprep.mubr.bf16.mxu1 %v2761_v6 }
 0x2de   :  { %3098 = vmatmul.mubr.bf16.vlgmr.msra.gmra.mxu1 %v2760_v3 }
 0x35e   :  { %v3539_v4 = vpop.f32.mrf.mxu0 }
 0x360   :  { %v3540_v35 = vpop.f32.mrf.mxu0 }
 0x361   :  { %v3541_v63 = vadd.f32 %v3540_v35, %v3539_v4 }
 0x362   :  { %v3542_v62 = vpop.f32.mrf.mxu0 }
 0x363   :  { %v3060_v10 = vadd.f32 %v3541_v63, %v3490_v47 }
 0x364   :  { %v3543_v5 = vpop.f32.mrf.mxu0 }
 0x39e   :  { %v3561_v8 = vpop.f32.mrf.mxu1 }
 0x3a0   :  { %v3562_v9 = vpop.f32.mrf.mxu1 }
 0x3a1   :  { %v3563_v11 = vadd.f32 %v3562_v9, %v3561_v8 }
 0x3a2   :  { %v3564_v12 = vpop.f32.mrf.mxu1 }
 0x3a3   :  { %v3100_v13 = vadd.f32 %v3563_v11, %v3060_v10 }
 0x3a4   :  { %v3565_v14 = vpop.f32.mrf.mxu1 }
 0x3a5   :  { %3105 = vmax.xlane.f32.xlu0 %v3100_v13 }
 0x42e   :  { %v3106_v17 = vpop.xlane.xlu0 %3105 }
 0x42f   :  { %v3107_v20 = vsub.f32 %v3100_v13, %v3106_v17 }
 0x431   :  { %v3108_v23 = vmul.f32 1.442695, %v3107_v20 }
 0x433   :  { %4143 = vpow2.f32 %v3108_v23 }
 0x440   :  { %v4144_v24 = vpop.eup %4143 }
 0x441   :  { %3110 = vadd.xlane.f32.xlu0 %v4144_v24 }
 0x4ca   :  { %v3111_v25 = vpop.xlane.xlu0 %3110 }
 0x4cb   :  { %4145 = vrcp.f32 %v3111_v25 }
 0x4d8   :  { %v4146_v26 = vpop.eup %4145 }
 0x4d9   :  { %v3113_v27 = vmul.f32 %v4146_v26, %v4144_v24 }
 0x4db   :  { %3114 = vst [vmem:[#allocation8] sm:$0xff] %v3113_v27 }
 0x4dc   :  { %4219 = shalt.err (!%p4216_p5)
}
 0x4dd   :  { %3124 = dma.vmem_to_hbm [thread:$0]  %s3122_s8, 128, %s4406_s7, [#allocation4]  }
 0x4de   :  { %4232 = dma.done.wait [#allocation4], 128  }
 0x4df   :  { %4233 = vsyncadd [#allocation4], 4294967168 }
 0x4e0   :  { %3128 = vsyncpa [#allocation3], 1 }
 0x4e1   :  { %3129 = vsyncpa [#allocation6], 1 }
 0x4e2   :  { %3130 = vsyncpa [#allocation4], 1 }

</bundles_post_ra>
